<compile_context>
chip_gen: v7x
topology: tpu7x:2x2x1
jax: 0.10.0
libtpu: 0.0.40
codegen_flags: <defaults>
</compile_context>

<pallas_src>
import functools

import jax
import jax.numpy as jnp
import numpy as np
from jax.experimental import pallas as pl
from jax.experimental.pallas import tpu as pltpu


def _round_up(x, m):
    return ((x + m - 1) // m) * m


def _smplnn_kernel(pts_ref, nn_ref, vtt_ref, out_ref):
    pts = pts_ref[...]                        # (16, tm) channel-major point slab
    tm = pts.shape[1]
    n_chunks, chunk_c, _ = nn_ref.shape

    pts4 = pts[0:4, :]                        # rows: x, y, z, 1

    # Chunk-local vertex-index iota, hoisted out of the chunk loop
    # (broadcast_in_dim is not CSE'd by JAX; build it once per tile).
    iota_c = jax.lax.broadcasted_iota(jnp.int32, (chunk_c, tm), 0)

    def body(i, carry):
        run_min, t_run = carry
        # ---- distances for this vertex chunk: ||v||^2 - 2 v.x  (MXU, K=4) ----
        d = jnp.dot(nn_ref[i], pts4,
                    preferred_element_type=jnp.float32)          # (C, tm)
        cmin = jnp.min(d, axis=0, keepdims=True)                 # (1, tm)
        # first-index argmin inside the chunk (ties -> smallest index)
        local = jnp.min(jnp.where(d <= cmin, iota_c, chunk_c),
                        axis=0, keepdims=True)                   # (1, tm)
        one_hot = (iota_c == local).astype(jnp.float32)          # (C, tm)
        # ---- bone transform of the chunk-local winner: (16,C) @ (C,tm) ----
        t_cand = jnp.dot(vtt_ref[i], one_hot,
                         preferred_element_type=jnp.float32)     # (16, tm)
        # strict improvement preserves global first-index tie semantics
        # because chunks are processed in ascending vertex order.
        better = cmin < run_min                                  # (1, tm)
        run_min = jnp.where(better, cmin, run_min)
        t_run = jnp.where(better, t_cand, t_run)
        return run_min, t_run

    init = (jnp.full((1, tm), jnp.inf, jnp.float32),
            jnp.zeros((16, tm), jnp.float32))
    _, T = jax.lax.fori_loop(0, n_chunks, body, init)            # (16, tm)

    def t(r, k):  # T_fwd[:, r, k] as a lane-dense (1, tm) row
        return T[4 * r + k:4 * r + k + 1, :]

    # ---- x_bar = (T_fwd @ [xyz, 1])[:3] ----
    x, y, z = pts[0:1, :], pts[1:2, :], pts[2:3, :]
    x_bar = [t(r, 0) * x + t(r, 1) * y + t(r, 2) * z + t(r, 3) for r in range(3)]

    # ---- build_rotation(quaternion) ----
    q = pts[4:8, :]
    inv_n = jax.lax.rsqrt(jnp.sum(q * q, axis=0, keepdims=True))
    rw = q[0:1, :] * inv_n
    qx = q[1:2, :] * inv_n
    qy = q[2:3, :] * inv_n
    qz = q[3:4, :] * inv_n
    R = [[1.0 - 2.0 * (qy * qy + qz * qz), 2.0 * (qx * qy - rw * qz), 2.0 * (qx * qz + rw * qy)],
         [2.0 * (qx * qy + rw * qz), 1.0 - 2.0 * (qx * qx + qz * qz), 2.0 * (qy * qz - rw * qx)],
         [2.0 * (qx * qz - rw * qy), 2.0 * (qy * qz + rw * qx), 1.0 - 2.0 * (qx * qx + qy * qy)]]

    # ---- rotation_bar = T_fwd[:, :3, :3] @ rotation_hat ----
    rot_bar = [t(r, 0) * R[0][c] + t(r, 1) * R[1][c] + t(r, 2) * R[2][c]
               for r in range(3) for c in range(3)]

    # ---- normal rotation ('3dgs' branch) ----
    nx, ny, nz = pts[8:9, :], pts[9:10, :], pts[10:11, :]
    n_bar = [t(r, 0) * nx + t(r, 1) * ny + t(r, 2) * nz for r in range(3)]

    # ---- 8-sublane-aligned, lane-dense stores ----
    pad_row = jnp.zeros_like(x)
    lower = x_bar + rot_bar + n_bar + [pad_row]                  # 16 rows
    out_ref[0:16, :] = T
    out_ref[16:24, :] = jnp.concatenate(lower[0:8], axis=0)
    out_ref[24:32, :] = jnp.concatenate(lower[8:16], axis=0)


@functools.partial(jax.jit, static_argnames=("tile_m", "chunk_nv"))
def smplnn_forward(xyz, rotation_q, normal, smpl_verts, skinning_weights,
                   bone_transforms, *, tile_m=256, chunk_nv=256):
    """Pallas implementation of SMPLNN.forward ('3dgs' branch).

    Returns (T_fwd [n,4,4], x_bar [n,3], rotation_bar [n,3,3], normal_bar [n,3]).
    tile_m: points per grid step (256 is a good default; v6e/128-MiB parts can
            use 512, keep <=256 on v7x). chunk_nv: vertices per in-kernel chunk.
    """
    f32 = jnp.float32
    n_pts = xyz.shape[0]
    nv = smpl_verts.shape[0]
    nj = skinning_weights.shape[1]

    xyz = xyz.astype(f32)
    quat = rotation_q.astype(f32)
    normal = normal.astype(f32)
    verts = smpl_verts.astype(f32)
    skin_w = skinning_weights.astype(f32)
    bones_flat = bone_transforms.reshape(nj, 16).astype(f32)

    # ---- hoisted, grid-invariant precompute (done once, outside the kernel) ----
    vert_t_T = (skin_w @ bones_flat).T                           # (16, Nv)
    vnorm = jnp.sum(verts * verts, axis=-1, keepdims=True)       # (Nv, 1)
    nn_mat = jnp.concatenate([-2.0 * verts, vnorm], axis=-1)     # (Nv, 4)

    # ---- pad + pre-chunk the vertex axis for the in-kernel fori_loop ----
    chunk_c = min(chunk_nv, _round_up(nv, 8))
    n_chunks = -(-nv // chunk_c)
    nv_pad = n_chunks * chunk_c
    vpad = nv_pad - nv
    if vpad:
        nn_mat = jnp.pad(nn_mat, ((0, vpad), (0, 0)))
        # padded vertices: huge squared norm so they never win the 1-NN
        nn_mat = nn_mat.at[nv:, 3].set(1e30)
        vert_t_T = jnp.pad(vert_t_T, ((0, 0), (0, vpad)))
    nn_c = nn_mat.reshape(n_chunks, chunk_c, 4)
    vtt_c = vert_t_T.reshape(16, n_chunks, chunk_c).transpose(1, 0, 2)  # (nc,16,C)

    # ---- pack the narrow point tensors into one slab, pad to a full tile ----
    n_blocks = -(-n_pts // tile_m)
    n_pad = n_blocks * tile_m
    ppad = n_pad - n_pts
    pts_packed = jnp.concatenate(
        [xyz, jnp.ones((n_pts, 1), f32), quat, normal,
         jnp.zeros((n_pts, 5), f32)], axis=-1)                   # (n, 16)
    pts_packed = jnp.pad(pts_packed, ((0, ppad), (0, 0)))
    if ppad:
        # keep padded quaternions valid so dead lanes stay finite
        pts_packed = pts_packed.at[n_pts:, 4].set(1.0)
    pts_T = pts_packed.T                                         # (16, n_pad)

    out_T = pl.pallas_call(
        _smplnn_kernel,
        out_shape=jax.ShapeDtypeStruct((32, n_pad), f32),
        grid_spec=pltpu.PrefetchScalarGridSpec(
            num_scalar_prefetch=0,
            grid=(n_blocks,),
            in_specs=[
                pl.BlockSpec((16, tile_m), lambda i: (0, i)),            # points
                pl.BlockSpec((n_chunks, chunk_c, 4), lambda i: (0, 0, 0)),   # [-2V | ||v||^2]
                pl.BlockSpec((n_chunks, 16, chunk_c), lambda i: (0, 0, 0)),  # vert_T^T chunks
            ],
            out_specs=pl.BlockSpec((32, tile_m), lambda i: (0, i)),
        ),
        compiler_params=pltpu.CompilerParams(
            dimension_semantics=("parallel",),
            vmem_limit_bytes=32 * 1024 * 1024),
    )(pts_T, nn_c, vtt_c)

    # TODO(synk): output un-transpose is a small XLA-side HBM round trip; emit
    #   natural-layout outputs only if the consumer needs them that way.
    out = out_T[:, :n_pts]                                       # (32, n_pts)
    t_fwd = out[0:16].T.reshape(n_pts, 4, 4)
    x_bar = out[16:19].T
    rot_bar = out[19:28].T.reshape(n_pts, 3, 3)
    n_bar = out[28:31].T
    return t_fwd, x_bar, rot_bar, n_bar


def _reference(xyz, quat, normal, verts, skin_w, bones):
    d = jnp.sum((xyz[:, None, :] - verts[None, :, :]) ** 2, axis=-1)
    idx = jnp.argmin(d, axis=-1)
    pts_w = skin_w[idx]
    T = (pts_w @ bones.reshape(-1, 16)).reshape(-1, 4, 4)
    homo = jnp.concatenate([xyz, jnp.ones((xyz.shape[0], 1), jnp.float32)], -1)
    x_bar = jnp.einsum("nij,nj->ni", T, homo)[:, :3]
    qn = quat / jnp.linalg.norm(quat, axis=-1, keepdims=True)
    r, x, y, z = qn[:, 0], qn[:, 1], qn[:, 2], qn[:, 3]
    R = jnp.stack([
        jnp.stack([1 - 2 * (y * y + z * z), 2 * (x * y - r * z), 2 * (x * z + r * y)], -1),
        jnp.stack([2 * (x * y + r * z), 1 - 2 * (x * x + z * z), 2 * (y * z - r * x)], -1),
        jnp.stack([2 * (x * z - r * y), 2 * (y * z + r * x), 1 - 2 * (x * x + y * y)], -1),
    ], axis=-2)
    rot_bar = jnp.einsum("nij,njk->nik", T[:, :3, :3], R)
    n_bar = jnp.einsum("nij,nj->ni", T[:, :3, :3], normal)
    return T, x_bar, rot_bar, n_bar


if __name__ == "__main__":
    key = jax.random.PRNGKey(0)
    k1, k2, k3, k4, k5, k6 = jax.random.split(key, 6)

    # n_pts NOT a multiple of tile_m (exercises point-tail padding);
    # n_verts NOT a multiple of chunk_nv (exercises vertex padding + chunk loop).
    n_pts, n_verts, n_joints = 300, 200, 24

    xyz = jax.random.normal(k1, (n_pts, 3), jnp.float32)
    quat = jax.random.normal(k2, (n_pts, 4), jnp.float32) + 0.1
    normal = jax.random.normal(k3, (n_pts, 3), jnp.float32)
    normal = normal / jnp.linalg.norm(normal, axis=-1, keepdims=True)

    smpl_verts = jax.random.normal(k4, (n_verts, 3), jnp.float32)
    skinning_weights = jax.nn.softmax(
        jax.random.normal(k5, (n_verts, n_joints), jnp.float32), axis=-1)

    # bone transforms: identity 4x4 + small random perturbation, last row fixed
    pert = 0.1 * jax.random.normal(k6, (n_joints, 4, 4), jnp.float32)
    bone_transforms = jnp.eye(4, dtype=jnp.float32)[None] + pert
    bone_transforms = bone_transforms.at[:, 3, :].set(
        jnp.array([0.0, 0.0, 0.0, 1.0], jnp.float32))

    outs = smplnn_forward(xyz, quat, normal, smpl_verts, skinning_weights,
                          bone_transforms, tile_m=256, chunk_nv=64)
    outs = jax.block_until_ready(outs)

    refs = _reference(xyz, quat, normal, smpl_verts, skinning_weights,
                      bone_transforms)
    for got, want in zip(outs, refs):
        np.testing.assert_allclose(np.asarray(got), np.asarray(want),
                                   rtol=1e-4, atol=1e-4)

    print("KERNEL_OK")
</pallas_src>

<mosaic_0001>
module attributes {stable_mosaic.version = 11 : i64} {
  func.func @_smplnn_kernel(%arg0: i32, %arg1: memref<16x256xf32, #tpu.memory_space<vmem>>, %arg2: memref<4x64x4xf32, #tpu.memory_space<vmem>>, %arg3: memref<4x16x64xf32, #tpu.memory_space<vmem>>, %arg4: memref<32x256xf32, #tpu.memory_space<vmem>>) attributes {dimension_semantics = [#tpu.dimension_semantics<parallel>], iteration_bounds = array<i64: 2>, scalar_prefetch = 0 : i64, scratch_operands = 0 : i64, tpu.core_type = #tpu.core_type<tc>, window_params = [{transform_indices = @transform_0, window_bounds = array<i64: 16, 256>}, {pipeline_mode = #tpu.pipeline_mode<synchronous>, transform_indices = @transform_1, window_bounds = array<i64: 4, 64, 4>}, {pipeline_mode = #tpu.pipeline_mode<synchronous>, transform_indices = @transform_2, window_bounds = array<i64: 4, 16, 64>}, {transform_indices = @transform_3, window_bounds = array<i64: 32, 256>}]} {
    %c0 = arith.constant 0 : index
    %c0_0 = arith.constant 0 : index
    %0 = vector.load %arg1[%c0, %c0_0] : memref<16x256xf32, #tpu.memory_space<vmem>>, vector<16x256xf32>
    %1 = vector.extract_strided_slice %0 {offsets = [0, 0], sizes = [4, 256], strides = [1, 1]} : vector<16x256xf32> to vector<4x256xf32>
    %2 = tpu.iota {dimensions = array<i32: 0>} : vector<64x256xi32>
    %cst = arith.constant 0x7F800000 : f32
    %3 = vector.broadcast %cst : f32 to vector<1x256xf32>
    %cst_1 = arith.constant 0.000000e+00 : f32
    %4 = vector.broadcast %cst_1 : f32 to vector<16x256xf32>
    %c0_i32 = arith.constant 0 : i32
    %c4_i32 = arith.constant 4 : i32
    %5 = arith.addi %c0_i32, %c4_i32 : i32
    %c1_i32 = arith.constant 1 : i32
    %6:2 = scf.for %arg5 = %c0_i32 to %5 step %c1_i32 iter_args(%arg6 = %3, %arg7 = %4) -> (vector<1x256xf32>, vector<16x256xf32>)  : i32 {
      %209 = arith.index_cast %arg5 : i32 to index
      %c0_21 = arith.constant 0 : index
      %c0_22 = arith.constant 0 : index
      %210 = vector.load %arg2[%209, %c0_21, %c0_22] : memref<4x64x4xf32, #tpu.memory_space<vmem>>, vector<1x64x4xf32>
      %211 = vector.shape_cast %210 : vector<1x64x4xf32> to vector<64x4xf32>
      %cst_23 = arith.constant dense<0.000000e+00> : vector<64x256xf32>
      %212 = tpu.matmul %211, %1, %cst_23 {dimension_numbers = #tpu.dot_dimension_numbers<[1], [0], [0], [1], [0, 0, 1, 1], [], []>} : vector<64x4xf32>, vector<4x256xf32>, vector<64x256xf32> -> vector<64x256xf32>
      %cst_24 = arith.constant dense<0x7F800000> : vector<256xf32>
      %213 = vector.multi_reduction <minimumf>, %212, %cst_24 [0] : vector<64x256xf32> to vector<256xf32>
      %214 = vector.shape_cast %213 : vector<256xf32> to vector<1x256xf32>
      %215 = vector.broadcast %214 : vector<1x256xf32> to vector<64x256xf32>
      %216 = arith.cmpf ole, %212, %215 : vector<64x256xf32>
      %c64_i32 = arith.constant 64 : i32
      %217 = vector.broadcast %c64_i32 : i32 to vector<64x256xi32>
      %218 = arith.select %216, %2, %217 : vector<64x256xi1>, vector<64x256xi32>
      %cst_25 = arith.constant dense<2147483647> : vector<256xi32>
      %219 = vector.multi_reduction <minsi>, %218, %cst_25 [0] : vector<64x256xi32> to vector<256xi32>
      %220 = vector.shape_cast %219 : vector<256xi32> to vector<1x256xi32>
      %221 = vector.broadcast %220 : vector<1x256xi32> to vector<64x256xi32>
      %222 = arith.cmpi eq, %2, %221 : vector<64x256xi32>
      %223 = arith.extui %222 : vector<64x256xi1> to vector<64x256xi32>
      %224 = arith.sitofp %223 : vector<64x256xi32> to vector<64x256xf32>
      %225 = arith.index_cast %arg5 : i32 to index
      %c0_26 = arith.constant 0 : index
      %c0_27 = arith.constant 0 : index
      %226 = vector.load %arg3[%225, %c0_26, %c0_27] : memref<4x16x64xf32, #tpu.memory_space<vmem>>, vector<1x16x64xf32>
      %227 = vector.shape_cast %226 : vector<1x16x64xf32> to vector<16x64xf32>
      %cst_28 = arith.constant dense<0.000000e+00> : vector<16x256xf32>
      %228 = tpu.matmul %227, %224, %cst_28 {dimension_numbers = #tpu.dot_dimension_numbers<[1], [0], [0], [1], [0, 0, 1, 1], [], []>} : vector<16x64xf32>, vector<64x256xf32>, vector<16x256xf32> -> vector<16x256xf32>
      %229 = arith.cmpf olt, %214, %arg6 : vector<1x256xf32>
      %230 = arith.select %229, %214, %arg6 : vector<1x256xi1>, vector<1x256xf32>
      %231 = vector.shape_cast %229 : vector<1x256xi1> to vector<1x256xi1>
      %232 = vector.broadcast %231 : vector<1x256xi1> to vector<16x256xi1>
      %233 = arith.select %232, %228, %arg7 : vector<16x256xi1>, vector<16x256xf32>
      scf.yield %230, %233 : vector<1x256xf32>, vector<16x256xf32>
    }
    %c4_i32_2 = arith.constant 4 : i32
    %7 = vector.extract_strided_slice %0 {offsets = [0, 0], sizes = [1, 256], strides = [1, 1]} : vector<16x256xf32> to vector<1x256xf32>
    %8 = vector.extract_strided_slice %0 {offsets = [1, 0], sizes = [1, 256], strides = [1, 1]} : vector<16x256xf32> to vector<1x256xf32>
    %9 = vector.extract_strided_slice %0 {offsets = [2, 0], sizes = [1, 256], strides = [1, 1]} : vector<16x256xf32> to vector<1x256xf32>
    %10 = vector.extract_strided_slice %6#1 {offsets = [0, 0], sizes = [1, 256], strides = [1, 1]} : vector<16x256xf32> to vector<1x256xf32>
    %11 = arith.mulf %10, %7 : vector<1x256xf32>
    %12 = vector.extract_strided_slice %6#1 {offsets = [1, 0], sizes = [1, 256], strides = [1, 1]} : vector<16x256xf32> to vector<1x256xf32>
    %13 = arith.mulf %12, %8 : vector<1x256xf32>
    %14 = arith.addf %11, %13 : vector<1x256xf32>
    %15 = vector.extract_strided_slice %6#1 {offsets = [2, 0], sizes = [1, 256], strides = [1, 1]} : vector<16x256xf32> to vector<1x256xf32>
    %16 = arith.mulf %15, %9 : vector<1x256xf32>
    %17 = arith.addf %14, %16 : vector<1x256xf32>
    %18 = vector.extract_strided_slice %6#1 {offsets = [3, 0], sizes = [1, 256], strides = [1, 1]} : vector<16x256xf32> to vector<1x256xf32>
    %19 = arith.addf %17, %18 : vector<1x256xf32>
    %20 = vector.extract_strided_slice %6#1 {offsets = [4, 0], sizes = [1, 256], strides = [1, 1]} : vector<16x256xf32> to vector<1x256xf32>
    %21 = arith.mulf %20, %7 : vector<1x256xf32>
    %22 = vector.extract_strided_slice %6#1 {offsets = [5, 0], sizes = [1, 256], strides = [1, 1]} : vector<16x256xf32> to vector<1x256xf32>
    %23 = arith.mulf %22, %8 : vector<1x256xf32>
    %24 = arith.addf %21, %23 : vector<1x256xf32>
    %25 = vector.extract_strided_slice %6#1 {offsets = [6, 0], sizes = [1, 256], strides = [1, 1]} : vector<16x256xf32> to vector<1x256xf32>
    %26 = arith.mulf %25, %9 : vector<1x256xf32>
    %27 = arith.addf %24, %26 : vector<1x256xf32>
    %28 = vector.extract_strided_slice %6#1 {offsets = [7, 0], sizes = [1, 256], strides = [1, 1]} : vector<16x256xf32> to vector<1x256xf32>
    %29 = arith.addf %27, %28 : vector<1x256xf32>
    %30 = vector.extract_strided_slice %6#1 {offsets = [8, 0], sizes = [1, 256], strides = [1, 1]} : vector<16x256xf32> to vector<1x256xf32>
    %31 = arith.mulf %30, %7 : vector<1x256xf32>
    %32 = vector.extract_strided_slice %6#1 {offsets = [9, 0], sizes = [1, 256], strides = [1, 1]} : vector<16x256xf32> to vector<1x256xf32>
    %33 = arith.mulf %32, %8 : vector<1x256xf32>
    %34 = arith.addf %31, %33 : vector<1x256xf32>
    %35 = vector.extract_strided_slice %6#1 {offsets = [10, 0], sizes = [1, 256], strides = [1, 1]} : vector<16x256xf32> to vector<1x256xf32>
    %36 = arith.mulf %35, %9 : vector<1x256xf32>
    %37 = arith.addf %34, %36 : vector<1x256xf32>
    %38 = vector.extract_strided_slice %6#1 {offsets = [11, 0], sizes = [1, 256], strides = [1, 1]} : vector<16x256xf32> to vector<1x256xf32>
    %39 = arith.addf %37, %38 : vector<1x256xf32>
    %40 = vector.extract_strided_slice %0 {offsets = [4, 0], sizes = [4, 256], strides = [1, 1]} : vector<16x256xf32> to vector<4x256xf32>
    %41 = arith.mulf %40, %40 : vector<4x256xf32>
    %cst_3 = arith.constant dense<0.000000e+00> : vector<256xf32>
    %42 = vector.multi_reduction <add>, %41, %cst_3 [0] : vector<4x256xf32> to vector<256xf32>
    %43 = vector.shape_cast %42 : vector<256xf32> to vector<1x256xf32>
    %44 = math.rsqrt %43 : vector<1x256xf32>
    %45 = vector.extract_strided_slice %40 {offsets = [0, 0], sizes = [1, 256], strides = [1, 1]} : vector<4x256xf32> to vector<1x256xf32>
    %46 = arith.mulf %45, %44 : vector<1x256xf32>
    %47 = vector.extract_strided_slice %40 {offsets = [1, 0], sizes = [1, 256], strides = [1, 1]} : vector<4x256xf32> to vector<1x256xf32>
    %48 = arith.mulf %47, %44 : vector<1x256xf32>
    %49 = vector.extract_strided_slice %40 {offsets = [2, 0], sizes = [1, 256], strides = [1, 1]} : vector<4x256xf32> to vector<1x256xf32>
    %50 = arith.mulf %49, %44 : vector<1x256xf32>
    %51 = vector.extract_strided_slice %40 {offsets = [3, 0], sizes = [1, 256], strides = [1, 1]} : vector<4x256xf32> to vector<1x256xf32>
    %52 = arith.mulf %51, %44 : vector<1x256xf32>
    %53 = arith.mulf %50, %50 : vector<1x256xf32>
    %54 = arith.mulf %52, %52 : vector<1x256xf32>
    %55 = arith.addf %53, %54 : vector<1x256xf32>
    %cst_4 = arith.constant 2.000000e+00 : f32
    %56 = vector.broadcast %cst_4 : f32 to vector<1x256xf32>
    %57 = arith.mulf %56, %55 : vector<1x256xf32>
    %cst_5 = arith.constant 1.000000e+00 : f32
    %58 = vector.broadcast %cst_5 : f32 to vector<1x256xf32>
    %59 = arith.subf %58, %57 : vector<1x256xf32>
    %60 = arith.mulf %48, %50 : vector<1x256xf32>
    %61 = arith.mulf %46, %52 : vector<1x256xf32>
    %62 = arith.subf %60, %61 : vector<1x256xf32>
    %cst_6 = arith.constant 2.000000e+00 : f32
    %63 = vector.broadcast %cst_6 : f32 to vector<1x256xf32>
    %64 = arith.mulf %63, %62 : vector<1x256xf32>
    %65 = arith.mulf %48, %52 : vector<1x256xf32>
    %66 = arith.mulf %46, %50 : vector<1x256xf32>
    %67 = arith.addf %65, %66 : vector<1x256xf32>
    %cst_7 = arith.constant 2.000000e+00 : f32
    %68 = vector.broadcast %cst_7 : f32 to vector<1x256xf32>
    %69 = arith.mulf %68, %67 : vector<1x256xf32>
    %70 = arith.mulf %48, %50 : vector<1x256xf32>
    %71 = arith.mulf %46, %52 : vector<1x256xf32>
    %72 = arith.addf %70, %71 : vector<1x256xf32>
    %cst_8 = arith.constant 2.000000e+00 : f32
    %73 = vector.broadcast %cst_8 : f32 to vector<1x256xf32>
    %74 = arith.mulf %73, %72 : vector<1x256xf32>
    %75 = arith.mulf %48, %48 : vector<1x256xf32>
    %76 = arith.mulf %52, %52 : vector<1x256xf32>
    %77 = arith.addf %75, %76 : vector<1x256xf32>
    %cst_9 = arith.constant 2.000000e+00 : f32
    %78 = vector.broadcast %cst_9 : f32 to vector<1x256xf32>
    %79 = arith.mulf %78, %77 : vector<1x256xf32>
    %cst_10 = arith.constant 1.000000e+00 : f32
    %80 = vector.broadcast %cst_10 : f32 to vector<1x256xf32>
    %81 = arith.subf %80, %79 : vector<1x256xf32>
    %82 = arith.mulf %50, %52 : vector<1x256xf32>
    %83 = arith.mulf %46, %48 : vector<1x256xf32>
    %84 = arith.subf %82, %83 : vector<1x256xf32>
    %cst_11 = arith.constant 2.000000e+00 : f32
    %85 = vector.broadcast %cst_11 : f32 to vector<1x256xf32>
    %86 = arith.mulf %85, %84 : vector<1x256xf32>
    %87 = arith.mulf %48, %52 : vector<1x256xf32>
    %88 = arith.mulf %46, %50 : vector<1x256xf32>
    %89 = arith.subf %87, %88 : vector<1x256xf32>
    %cst_12 = arith.constant 2.000000e+00 : f32
    %90 = vector.broadcast %cst_12 : f32 to vector<1x256xf32>
    %91 = arith.mulf %90, %89 : vector<1x256xf32>
    %92 = arith.mulf %50, %52 : vector<1x256xf32>
    %93 = arith.mulf %46, %48 : vector<1x256xf32>
    %94 = arith.addf %92, %93 : vector<1x256xf32>
    %cst_13 = arith.constant 2.000000e+00 : f32
    %95 = vector.broadcast %cst_13 : f32 to vector<1x256xf32>
    %96 = arith.mulf %95, %94 : vector<1x256xf32>
    %97 = arith.mulf %48, %48 : vector<1x256xf32>
    %98 = arith.mulf %50, %50 : vector<1x256xf32>
    %99 = arith.addf %97, %98 : vector<1x256xf32>
    %cst_14 = arith.constant 2.000000e+00 : f32
    %100 = vector.broadcast %cst_14 : f32 to vector<1x256xf32>
    %101 = arith.mulf %100, %99 : vector<1x256xf32>
    %cst_15 = arith.constant 1.000000e+00 : f32
    %102 = vector.broadcast %cst_15 : f32 to vector<1x256xf32>
    %103 = arith.subf %102, %101 : vector<1x256xf32>
    %104 = vector.extract_strided_slice %6#1 {offsets = [0, 0], sizes = [1, 256], strides = [1, 1]} : vector<16x256xf32> to vector<1x256xf32>
    %105 = arith.mulf %104, %59 : vector<1x256xf32>
    %106 = vector.extract_strided_slice %6#1 {offsets = [1, 0], sizes = [1, 256], strides = [1, 1]} : vector<16x256xf32> to vector<1x256xf32>
    %107 = arith.mulf %106, %74 : vector<1x256xf32>
    %108 = arith.addf %105, %107 : vector<1x256xf32>
    %109 = vector.extract_strided_slice %6#1 {offsets = [2, 0], sizes = [1, 256], strides = [1, 1]} : vector<16x256xf32> to vector<1x256xf32>
    %110 = arith.mulf %109, %91 : vector<1x256xf32>
    %111 = arith.addf %108, %110 : vector<1x256xf32>
    %112 = vector.extract_strided_slice %6#1 {offsets = [0, 0], sizes = [1, 256], strides = [1, 1]} : vector<16x256xf32> to vector<1x256xf32>
    %113 = arith.mulf %112, %64 : vector<1x256xf32>
    %114 = vector.extract_strided_slice %6#1 {offsets = [1, 0], sizes = [1, 256], strides = [1, 1]} : vector<16x256xf32> to vector<1x256xf32>
    %115 = arith.mulf %114, %81 : vector<1x256xf32>
    %116 = arith.addf %113, %115 : vector<1x256xf32>
    %117 = vector.extract_strided_slice %6#1 {offsets = [2, 0], sizes = [1, 256], strides = [1, 1]} : vector<16x256xf32> to vector<1x256xf32>
    %118 = arith.mulf %117, %96 : vector<1x256xf32>
    %119 = arith.addf %116, %118 : vector<1x256xf32>
    %120 = vector.extract_strided_slice %6#1 {offsets = [0, 0], sizes = [1, 256], strides = [1, 1]} : vector<16x256xf32> to vector<1x256xf32>
    %121 = arith.mulf %120, %69 : vector<1x256xf32>
    %122 = vector.extract_strided_slice %6#1 {offsets = [1, 0], sizes = [1, 256], strides = [1, 1]} : vector<16x256xf32> to vector<1x256xf32>
    %123 = arith.mulf %122, %86 : vector<1x256xf32>
    %124 = arith.addf %121, %123 : vector<1x256xf32>
    %125 = vector.extract_strided_slice %6#1 {offsets = [2, 0], sizes = [1, 256], strides = [1, 1]} : vector<16x256xf32> to vector<1x256xf32>
    %126 = arith.mulf %125, %103 : vector<1x256xf32>
    %127 = arith.addf %124, %126 : vector<1x256xf32>
    %128 = vector.extract_strided_slice %6#1 {offsets = [4, 0], sizes = [1, 256], strides = [1, 1]} : vector<16x256xf32> to vector<1x256xf32>
    %129 = arith.mulf %128, %59 : vector<1x256xf32>
    %130 = vector.extract_strided_slice %6#1 {offsets = [5, 0], sizes = [1, 256], strides = [1, 1]} : vector<16x256xf32> to vector<1x256xf32>
    %131 = arith.mulf %130, %74 : vector<1x256xf32>
    %132 = arith.addf %129, %131 : vector<1x256xf32>
    %133 = vector.extract_strided_slice %6#1 {offsets = [6, 0], sizes = [1, 256], strides = [1, 1]} : vector<16x256xf32> to vector<1x256xf32>
    %134 = arith.mulf %133, %91 : vector<1x256xf32>
    %135 = arith.addf %132, %134 : vector<1x256xf32>
    %136 = vector.extract_strided_slice %6#1 {offsets = [4, 0], sizes = [1, 256], strides = [1, 1]} : vector<16x256xf32> to vector<1x256xf32>
    %137 = arith.mulf %136, %64 : vector<1x256xf32>
    %138 = vector.extract_strided_slice %6#1 {offsets = [5, 0], sizes = [1, 256], strides = [1, 1]} : vector<16x256xf32> to vector<1x256xf32>
    %139 = arith.mulf %138, %81 : vector<1x256xf32>
    %140 = arith.addf %137, %139 : vector<1x256xf32>
    %141 = vector.extract_strided_slice %6#1 {offsets = [6, 0], sizes = [1, 256], strides = [1, 1]} : vector<16x256xf32> to vector<1x256xf32>
    %142 = arith.mulf %141, %96 : vector<1x256xf32>
    %143 = arith.addf %140, %142 : vector<1x256xf32>
    %144 = vector.extract_strided_slice %6#1 {offsets = [4, 0], sizes = [1, 256], strides = [1, 1]} : vector<16x256xf32> to vector<1x256xf32>
    %145 = arith.mulf %144, %69 : vector<1x256xf32>
    %146 = vector.extract_strided_slice %6#1 {offsets = [5, 0], sizes = [1, 256], strides = [1, 1]} : vector<16x256xf32> to vector<1x256xf32>
    %147 = arith.mulf %146, %86 : vector<1x256xf32>
    %148 = arith.addf %145, %147 : vector<1x256xf32>
    %149 = vector.extract_strided_slice %6#1 {offsets = [6, 0], sizes = [1, 256], strides = [1, 1]} : vector<16x256xf32> to vector<1x256xf32>
    %150 = arith.mulf %149, %103 : vector<1x256xf32>
    %151 = arith.addf %148, %150 : vector<1x256xf32>
    %152 = vector.extract_strided_slice %6#1 {offsets = [8, 0], sizes = [1, 256], strides = [1, 1]} : vector<16x256xf32> to vector<1x256xf32>
    %153 = arith.mulf %152, %59 : vector<1x256xf32>
    %154 = vector.extract_strided_slice %6#1 {offsets = [9, 0], sizes = [1, 256], strides = [1, 1]} : vector<16x256xf32> to vector<1x256xf32>
    %155 = arith.mulf %154, %74 : vector<1x256xf32>
    %156 = arith.addf %153, %155 : vector<1x256xf32>
    %157 = vector.extract_strided_slice %6#1 {offsets = [10, 0], sizes = [1, 256], strides = [1, 1]} : vector<16x256xf32> to vector<1x256xf32>
    %158 = arith.mulf %157, %91 : vector<1x256xf32>
    %159 = arith.addf %156, %158 : vector<1x256xf32>
    %160 = vector.extract_strided_slice %6#1 {offsets = [8, 0], sizes = [1, 256], strides = [1, 1]} : vector<16x256xf32> to vector<1x256xf32>
    %161 = arith.mulf %160, %64 : vector<1x256xf32>
    %162 = vector.extract_strided_slice %6#1 {offsets = [9, 0], sizes = [1, 256], strides = [1, 1]} : vector<16x256xf32> to vector<1x256xf32>
    %163 = arith.mulf %162, %81 : vector<1x256xf32>
    %164 = arith.addf %161, %163 : vector<1x256xf32>
    %165 = vector.extract_strided_slice %6#1 {offsets = [10, 0], sizes = [1, 256], strides = [1, 1]} : vector<16x256xf32> to vector<1x256xf32>
    %166 = arith.mulf %165, %96 : vector<1x256xf32>
    %167 = arith.addf %164, %166 : vector<1x256xf32>
    %168 = vector.extract_strided_slice %6#1 {offsets = [8, 0], sizes = [1, 256], strides = [1, 1]} : vector<16x256xf32> to vector<1x256xf32>
    %169 = arith.mulf %168, %69 : vector<1x256xf32>
    %170 = vector.extract_strided_slice %6#1 {offsets = [9, 0], sizes = [1, 256], strides = [1, 1]} : vector<16x256xf32> to vector<1x256xf32>
    %171 = arith.mulf %170, %86 : vector<1x256xf32>
    %172 = arith.addf %169, %171 : vector<1x256xf32>
    %173 = vector.extract_strided_slice %6#1 {offsets = [10, 0], sizes = [1, 256], strides = [1, 1]} : vector<16x256xf32> to vector<1x256xf32>
    %174 = arith.mulf %173, %103 : vector<1x256xf32>
    %175 = arith.addf %172, %174 : vector<1x256xf32>
    %176 = vector.extract_strided_slice %0 {offsets = [8, 0], sizes = [1, 256], strides = [1, 1]} : vector<16x256xf32> to vector<1x256xf32>
    %177 = vector.extract_strided_slice %0 {offsets = [9, 0], sizes = [1, 256], strides = [1, 1]} : vector<16x256xf32> to vector<1x256xf32>
    %178 = vector.extract_strided_slice %0 {offsets = [10, 0], sizes = [1, 256], strides = [1, 1]} : vector<16x256xf32> to vector<1x256xf32>
    %179 = vector.extract_strided_slice %6#1 {offsets = [0, 0], sizes = [1, 256], strides = [1, 1]} : vector<16x256xf32> to vector<1x256xf32>
    %180 = arith.mulf %179, %176 : vector<1x256xf32>
    %181 = vector.extract_strided_slice %6#1 {offsets = [1, 0], sizes = [1, 256], strides = [1, 1]} : vector<16x256xf32> to vector<1x256xf32>
    %182 = arith.mulf %181, %177 : vector<1x256xf32>
    %183 = arith.addf %180, %182 : vector<1x256xf32>
    %184 = vector.extract_strided_slice %6#1 {offsets = [2, 0], sizes = [1, 256], strides = [1, 1]} : vector<16x256xf32> to vector<1x256xf32>
    %185 = arith.mulf %184, %178 : vector<1x256xf32>
    %186 = arith.addf %183, %185 : vector<1x256xf32>
    %187 = vector.extract_strided_slice %6#1 {offsets = [4, 0], sizes = [1, 256], strides = [1, 1]} : vector<16x256xf32> to vector<1x256xf32>
    %188 = arith.mulf %187, %176 : vector<1x256xf32>
    %189 = vector.extract_strided_slice %6#1 {offsets = [5, 0], sizes = [1, 256], strides = [1, 1]} : vector<16x256xf32> to vector<1x256xf32>
    %190 = arith.mulf %189, %177 : vector<1x256xf32>
    %191 = arith.addf %188, %190 : vector<1x256xf32>
    %192 = vector.extract_strided_slice %6#1 {offsets = [6, 0], sizes = [1, 256], strides = [1, 1]} : vector<16x256xf32> to vector<1x256xf32>
    %193 = arith.mulf %192, %178 : vector<1x256xf32>
    %194 = arith.addf %191, %193 : vector<1x256xf32>
    %195 = vector.extract_strided_slice %6#1 {offsets = [8, 0], sizes = [1, 256], strides = [1, 1]} : vector<16x256xf32> to vector<1x256xf32>
    %196 = arith.mulf %195, %176 : vector<1x256xf32>
    %197 = vector.extract_strided_slice %6#1 {offsets = [9, 0], sizes = [1, 256], strides = [1, 1]} : vector<16x256xf32> to vector<1x256xf32>
    %198 = arith.mulf %197, %177 : vector<1x256xf32>
    %199 = arith.addf %196, %198 : vector<1x256xf32>
    %200 = vector.extract_strided_slice %6#1 {offsets = [10, 0], sizes = [1, 256], strides = [1, 1]} : vector<16x256xf32> to vector<1x256xf32>
    %201 = arith.mulf %200, %178 : vector<1x256xf32>
    %202 = arith.addf %199, %201 : vector<1x256xf32>
    %cst_16 = arith.constant 0.000000e+00 : f32
    %203 = vector.broadcast %cst_16 : f32 to vector<1x256xf32>
    %c0_17 = arith.constant 0 : index
    %c0_18 = arith.constant 0 : index
    %204 = vector.load %arg4[%c0_17, %c0_18] : memref<32x256xf32, #tpu.memory_space<vmem>>, vector<16x256xf32>
    tpu.vector_store %arg4[%c0_17, %c0_18], %6#1 {strides = array<i32>} : memref<32x256xf32, #tpu.memory_space<vmem>>, vector<16x256xf32>,
    %205 = tpu.concatenate %19, %29, %39, %111, %119, %127, %135, %143 in 0 : vector<1x256xf32>, vector<1x256xf32>, vector<1x256xf32>, vector<1x256xf32>, vector<1x256xf32>, vector<1x256xf32>, vector<1x256xf32>, vector<1x256xf32> -> vector<8x256xf32>
    %c16 = arith.constant 16 : index
    %c0_19 = arith.constant 0 : index
    %206 = vector.load %arg4[%c16, %c0_19] : memref<32x256xf32, #tpu.memory_space<vmem>>, vector<8x256xf32>
    tpu.vector_store %arg4[%c16, %c0_19], %205 {strides = array<i32>} : memref<32x256xf32, #tpu.memory_space<vmem>>, vector<8x256xf32>,
    %207 = tpu.concatenate %151, %159, %167, %175, %186, %194, %202, %203 in 0 : vector<1x256xf32>, vector<1x256xf32>, vector<1x256xf32>, vector<1x256xf32>, vector<1x256xf32>, vector<1x256xf32>, vector<1x256xf32>, vector<1x256xf32> -> vector<8x256xf32>
    %c24 = arith.constant 24 : index
    %c0_20 = arith.constant 0 : index
    %208 = vector.load %arg4[%c24, %c0_20] : memref<32x256xf32, #tpu.memory_space<vmem>>, vector<8x256xf32>
    tpu.vector_store %arg4[%c24, %c0_20], %207 {strides = array<i32>} : memref<32x256xf32, #tpu.memory_space<vmem>>, vector<8x256xf32>,
    return
  }
  func.func @transform_0(%arg0: i32) -> (i32, i32) {
    %c0_i32 = arith.constant 0 : i32
    %c0_i32_0 = arith.constant 0 : i32
    return %c0_i32, %arg0 : i32, i32
  }
  func.func @transform_1(%arg0: i32) -> (i32, i32, i32) {
    %c0_i32 = arith.constant 0 : i32
    %c0_i32_0 = arith.constant 0 : i32
    %c0_i32_1 = arith.constant 0 : i32
    %c0_i32_2 = arith.constant 0 : i32
    return %c0_i32, %c0_i32_0, %c0_i32_1 : i32, i32, i32
  }
  func.func @transform_2(%arg0: i32) -> (i32, i32, i32) {
    %c0_i32 = arith.constant 0 : i32
    %c0_i32_0 = arith.constant 0 : i32
    %c0_i32_1 = arith.constant 0 : i32
    %c0_i32_2 = arith.constant 0 : i32
    return %c0_i32, %c0_i32_0, %c0_i32_1 : i32, i32, i32
  }
  func.func @transform_3(%arg0: i32) -> (i32, i32) {
    %c0_i32 = arith.constant 0 : i32
    %c0_i32_0 = arith.constant 0 : i32
    return %c0_i32, %arg0 : i32, i32
  }
}

</mosaic_0001>

<bundles_post_ra>
// kernel: smplnn_forward.1
= control target key start
LH: loop header
LB: loop body
LE: loop exit
PB: predicated region body
PF: predicated region fallthrough
CT: control target
= control target key end

     0   :  { %s1655_s12 = smov 0   ;;  %s1657_s13 = smov 0   ;;  %s2240_s0 = inlined_call_operand.vmem [shape: f32[16,512], index: 0, kind: input, shape index: {}]   ;;  %s2241_s1 = inlined_call_operand.vmem [shape: f32[4,64,4], index: 1, kind: input, shape index: {}]   ;;  %s2242_s2 = inlined_call_operand.vmem [shape: f32[4,16,64], index: 2, kind: input, shape index: {}]   ;;  %s2243_s3 = inlined_call_operand.vmem [shape: f32[32,512], index: 3, kind: output, shape index: {}]  }
   0x1   :  { %s1659_s14 = smov 0  }
   0x2 LB: > { %s1388_s15 = sadd.s32 4294967295, %s1603_s14   ;;  %s1672_s16 = sadd.s32 1, %s1603_s14   ;;  %s1603_s14 = sphi %s1659_s14, %s2271_s14   ;;  %s1599_s13 = sphi %s1657_s13, %s2270_s13   ;;  %s1595_s12 = sphi %s1655_s12, %s2269_s12  }
   0x3   : > { %s17_s17 = ssub.s32 %s1603_s14, %s1672_s16  ;;  %s20_s18 = sadd.s32 1, %s1599_s13 }
   0x4   : > { %p18_p0 = scmp.eq.s32.totalorder %s17_s17, 0  ;;  %p27_p1 = scmp.ne.s32.totalorder %s1599_s13, %s1595_s12 }
   0x5   : > { %p28_p2 = scmp.eq.s32.totalorder %s1603_s14, 0  ;;  %p99_p3 = scmp.eq.s32.totalorder %s1388_s15, 1 }
   0x6   : > { %s1683_s19 = scalar_select %p18_p0, %s1599_s13, %s20_s18  }
   0x7   : > { %p29_p4 = por %p28_p2, %p27_p1  ;;  %p1685_p5 = por %p99_p3, %p27_p1 }
   0x8   : > { %p1391_p6 = scmp.ge.s32.totalorder %s1603_s14, 2 }
   0xa   : > { %127 = sbr.rel (%p1391_p6) target bundleno = 24 (0x18), region = 24 }
  0x11   : > { %130 = sbr.rel (!%p29_p4) target bundleno = 24 (0x18), region = 28  ;;  %s132_s21 = sand.u32 (%p29_p4), 1, %s1599_s13  }
  0x12   : > { %s1449_s22 = sshll.u32 (%p29_p4), %s1603_s14, 4  ;;  %s1392_s23 = sshll.u32 (%p29_p4), %s132_s21, 5 }
  0x13   : > { %s137_s26 = scalar_lea.vmem (%p29_p4), %s2240_s0, %s1449_s22  ;;  %s134_s27 = scalar_lea.vmem (%p29_p4), [#allocation2], %s1392_s23 }
  0x14   : > { %v150_v0 = vld [vmem:[%s137_s26] sm:$0xff] (%p29_p4)  ;;  %v152_v1 = vld [vmem:[%s137_s26 + $0x8] sm:$0xff] (%p29_p4) }
  0x15   : > { %v154_v2 = vld [vmem:[%s137_s26 + $0x20] sm:$0xff] (%p29_p4)  ;;  %151 = vst [vmem:[%s134_s27] sm:$0xff] (%p29_p4), %v150_v0  ;;  %153 = vst [vmem:[%s134_s27 + $0x8] sm:$0xff] (%p29_p4), %v152_v1  ;;  %v156_v3 = vld [vmem:[%s137_s26 + $0x28] sm:$0xff] (%p29_p4) }
  0x16   : > { %155 = vst [vmem:[%s134_s27 + $0x10] sm:$0xff] (%p29_p4), %v154_v2  ;;  %157 = vst [vmem:[%s134_s27 + $0x18] sm:$0xff] (%p29_p4), %v156_v3 }
  0x18 PF: > { %p1395_p7 = scmp.ge.s32.totalorder %s1603_s14, 1  ;;  %p162_p8 = scmp.lt.s32.totalorder %s1603_s14, 3 }
  0x1a   : > { %p163_p9 = pnand %p1395_p7, %p162_p8 }
  0x1b   : > { %s169_s28 = sand.u32 (!%p163_p9), 1, %s1595_s12   ;;  %v197_v4 = vlaneseq (!%p163_p9)  ;;  %v1731_v17 = vmov (!%p163_p9), 0.0   ;;  %v1733_v18 = vmov (!%p163_p9), 0.0   ;;  %v1735_v19 = vmov (!%p163_p9), 0.0   ;;  %s1743_s6 = smov (!%p163_p9), 0  }
  0x1c   : > { %166 = sbr.rel (%p163_p9) target bundleno = 670 (0x29e), region = 51  ;;  %s1396_s29 = sshll.u32 (!%p163_p9), %s169_s28, 5  ;;  %v1737_v20 = vmov (!%p163_p9), 0.0   ;;  %v1739_v21 = vmov (!%p163_p9), inf   ;;  %v1741_v22 = vmov (!%p163_p9), inf  }
  0x1d   : > { %s1397_s30 = sshll.u32 (!%p163_p9), %s169_s28, 6  ;;  %v1698_v5 = vshrl.u32 (!%p163_p9), %v197_v4, 7  ;;  %s171_s4 = scalar_lea.vmem (!%p163_p9), [#allocation2], %s1396_s29 }
  0x1e   : > { %v1700_v6 = vld [vmem:[%s171_s4] sm:$0xff] (!%p163_p9)  ;;  %v1702_v7 = vld [vmem:[%s171_s4 + $0x8] sm:$0xff] (!%p163_p9)  ;;  %v1704_v8 = vld [vmem:[%s171_s4 + $0x10] sm:$0xff] (!%p163_p9)  ;;  %s1729_s5 = scalar_lea.vmem (!%p163_p9), [#allocation3], %s1397_s30 }
  0x1f   : > { %v1706_v9 = vld [vmem:[%s171_s4 + $0x18] sm:$0xff] (!%p163_p9)  ;;  %v1709_v10 = vadd.s32 (!%p163_p9), 8, %v1698_v5  ;;  %v1712_v11 = vadd.s32 (!%p163_p9), 16, %v1698_v5  ;;  %v1715_v12 = vadd.s32 (!%p163_p9), 24, %v1698_v5  ;;  %v1718_v13 = vadd.s32 (!%p163_p9), 32, %v1698_v5 }
  0x20   : > { %v1721_v14 = vadd.s32 (!%p163_p9), 40, %v1698_v5  ;;  %v1724_v15 = vadd.s32 (!%p163_p9), 48, %v1698_v5  ;;  %v1727_v16 = vadd.s32 (!%p163_p9), 56, %v1698_v5 }
  0x23 LB: >> { %vm2244_vm0 = vcmask 1043456   ;;  %v1633_v23 = vmov 0.0   ;;  %s1398_s7 = sshll.u32 %s1631_s6, 6  ;;  %vm228_vm1 = vcmask 31744   ;;  %s1425_s11 = sshll.u32 %s1631_s6, 4  ;;  %s1631_s6 = sphi %s1743_s6, %s211_s6   ;;  %v1627_v22 = vphi %v1741_v22, %v2258_v22   ;;  %v1623_v21 = vphi %v1739_v21, %v2257_v21   ;;  %v1619_v20 = vphi %v1737_v20, %v2256_v20   ;;  %v1615_v19 = vphi %v1735_v19, %v2255_v19   ;;  %v1611_v18 = vphi %v1733_v18, %v2254_v18   ;;  %v1607_v17 = vphi %v1731_v17, %v2253_v17  }
  0x24   : >> { %1399 = vmatprep.subr.msk.mxu0 %vm2244_vm0, %v1702_v7  ;;  %324 = vmatprep.mubr.f32.mxu0 %v1633_v23  ;;  %s219_s10 = scalar_lea.vmem %s2241_s1, %s1398_s7  ;;  %s526_s18 = scalar_lea.vmem %s2242_s2, %s1425_s11 }
  0x25   : >> { %1400 = vmatpush1.msk.msra.mxu0 %vm2244_vm0, %v1700_v6  ;;  %600 = vmatprep.mubr.f32.mxu1 %v1633_v23  ;;  %v220_v24 = vld [vmem:[%s219_s10] sm:$0xff]  ;;  %v221_v25 = vld [vmem:[%s219_s10 + $0x8] sm:$0xff]  ;;  %v222_v26 = vld [vmem:[%s219_s10 + $0x10] sm:$0xff]  ;;  %s211_s6 = sadd.s32 1, %s1631_s6  }
  0x26   : >> { %1401 = vmatmul.mubr.msk.f32.vlgmr.msra.gmra.mrb[0].mxu0 %vm228_vm1, %v220_v24  ;;  %v223_v27 = vld [vmem:[%s219_s10 + $0x18] sm:$0xff]  ;;  %v224_v28 = vld [vmem:[%s219_s10 + $0x20] sm:$0xff]  ;;  %v225_v29 = vld [vmem:[%s219_s10 + $0x28] sm:$0xff]  ;;  %p208_p10 = scmp.ge.s32.totalorder %s211_s6, 4  }
  0x27   : >> { %330 = vmatprep.mubr.f32.mxu0 %v1633_v23  ;;  %v226_v30 = vld [vmem:[%s219_s10 + $0x30] sm:$0xff]  ;;  %v227_v31 = vld [vmem:[%s219_s10 + $0x38] sm:$0xff] }
  0x2a   : >> { %1402 = vmatmul.mubr.msk.f32.gmra.mrb[2].mxu0 %vm228_vm1, %v221_v25 }
  0x2b   : >> { %336 = vmatprep.mubr.f32.mxu0 %v1633_v23 }
  0x2e   : >> { %1403 = vmatmul.mubr.msk.f32.gmra.mrb[4].mxu0 %vm228_vm1, %v222_v26 }
  0x2f   : >> { %342 = vmatprep.mubr.f32.mxu0 %v1633_v23 }
  0x32   : >> { %1404 = vmatmul.mubr.msk.f32.gmra.mrb[6].mxu0 %vm228_vm1, %v223_v27 }
  0x33   : >> { %348 = vmatprep.mubr.f32.mxu0 %v1633_v23 }
  0x36   : >> { %1405 = vmatmul.mubr.msk.f32.gmra.mrb[8].mxu0 %vm228_vm1, %v224_v28 }
  0x37   : >> { %354 = vmatprep.mubr.f32.mxu0 %v1633_v23 }
  0x3a   : >> { %1406 = vmatmul.mubr.msk.f32.gmra.mrb[10].mxu0 %vm228_vm1, %v225_v29 }
  0x3b   : >> { %360 = vmatprep.mubr.f32.mxu0 %v1633_v23 }
  0x3e   : >> { %1407 = vmatmul.mubr.msk.f32.gmra.mrb[12].mxu0 %vm228_vm1, %v226_v30 }
  0x3f   : >> { %366 = vmatprep.mubr.f32.mxu0 %v1633_v23 }
  0x42   : >> { %1408 = vmatmul.mubr.msk.f32.gmra.mrb[14].mxu0 %vm228_vm1, %v227_v31 }
  0xf9   : >> { %v326_v32 = vpop.f32.mrb[0].mxu0 }
  0xfa   : >> { %v1791_v33 = vpop.f32.mrb[1].mxu0 }
  0xfd   : >> { %v332_v34 = vpop.f32.mrb[2].mxu0 }
  0xfe   : >> { %v1793_v35 = vpop.f32.mrb[3].mxu0 }
 0x101   : >> { %v338_v36 = vpop.f32.mrb[4].mxu0 }
 0x102   : >> { %v373_v37 = vmin.f32 %v326_v32, %v338_v36  ;;  %v1795_v38 = vpop.f32.mrb[5].mxu0 }
 0x103   : >> { %v386_v39 = vmin.f32 %v1791_v33, %v1795_v38 }
 0x105   : >> { %v344_v40 = vpop.f32.mrb[6].mxu0 }
 0x106   : >> { %v374_v41 = vmin.f32 %v332_v34, %v344_v40  ;;  %v1799_v42 = vpop.f32.mrb[7].mxu0 }
 0x107   : >> { %v387_v43 = vmin.f32 %v1793_v35, %v1799_v42 }
 0x109   : >> { %v350_v44 = vpop.f32.mrb[8].mxu0 }
 0x10a   : >> { %v375_v45 = vmin.f32 %v373_v37, %v350_v44  ;;  %v1803_v46 = vpop.f32.mrb[9].mxu0 }
 0x10b   : >> { %v388_v47 = vmin.f32 %v386_v39, %v1803_v46 }
 0x10d   : >> { %v356_v48 = vpop.f32.mrb[10].mxu0 }
 0x10e   : >> { %v376_v49 = vmin.f32 %v374_v41, %v356_v48  ;;  %v1806_v50 = vpop.f32.mrb[11].mxu0 }
 0x10f   : >> { %v389_v51 = vmin.f32 %v387_v43, %v1806_v50 }
 0x111   : >> { %v362_v52 = vpop.f32.mrb[12].mxu0 }
 0x112   : >> { %v377_v53 = vmin.f32 %v375_v45, %v362_v52  ;;  %v1809_v54 = vpop.f32.mrb[13].mxu0 }
 0x113   : >> { %v390_v55 = vmin.f32 %v388_v47, %v1809_v54 }
 0x115   : >> { %v368_v56 = vpop.f32.mrb[14].mxu0 }
 0x116   : >> { %v378_v57 = vmin.f32 %v376_v49, %v368_v56  ;;  %v370_v58 = vpop.f32.mrb[15].mxu0 }
 0x117   : >> { %v391_v59 = vmin.f32 %v389_v51, %v370_v58 }
 0x118   : >> { %v379_v60 = vmin.f32 %v377_v53, %v378_v57 }
 0x119   : >> { %v392_v61 = vmin.f32 %v390_v55, %v391_v59 }
 0x11a   : >> { %v380_v62 = vrot.slane %v379_v60, 4 }
 0x11b   : >> { %v393_v63 = vrot.slane %v392_v61, 4 }
 0x11c   : >> { %v381_v0 = vmin.f32 %v379_v60, %v380_v62 }
 0x11d   : >> { %v394_v1 = vmin.f32 %v392_v61, %v393_v63 }
 0x11e   : >> { %v382_v2 = vrot.slane %v381_v0, 2 }
 0x11f   : >> { %v395_v3 = vrot.slane %v394_v1, 2 }
 0x120   : >> { %v383_v4 = vmin.f32 %v381_v0, %v382_v2 }
 0x121   : >> { %v396_v24 = vmin.f32 %v394_v1, %v395_v3 }
 0x122   : >> { %v384_v25 = vrot.slane %v383_v4, 1 }
 0x123   : >> { %v397_v26 = vrot.slane %v396_v24, 1 }
 0x124   : >> { %v1812_v27 = vmin.f32 %v383_v4, %v384_v25 }
 0x125   : >> { %v1814_v28 = vmin.f32 %v396_v24, %v397_v26 }
 0x126   : >> { %vm399_vm2 = vcmp.le.f32.partialorder %v326_v32, %v1812_v27  ;;  %vm401_vm3 = vcmp.le.f32.partialorder %v332_v34, %v1812_v27  ;;  %vm403_vm4 = vcmp.le.f32.partialorder %v338_v36, %v1812_v27  ;;  %vm405_vm5 = vcmp.le.f32.partialorder %v344_v40, %v1812_v27 }
 0x127   : >> { %vm407_vm6 = vcmp.le.f32.partialorder %v350_v44, %v1812_v27  ;;  %vm409_vm7 = vcmp.le.f32.partialorder %v356_v48, %v1812_v27  ;;  %vm411_vm8 = vcmp.le.f32.partialorder %v362_v52, %v1812_v27  ;;  %vm413_vm9 = vcmp.le.f32.partialorder %v368_v56, %v1812_v27 }
 0x128   : >> { %v415_v29 = vsel %vm399_vm2, %v1698_v5, 64  ;;  %v417_v30 = vsel %vm401_vm3, %v1709_v10, 64  ;;  %v419_v31 = vsel %vm403_vm4, %v1712_v11, 64  ;;  %v421_v32 = vsel %vm405_vm5, %v1715_v12, 64 }
 0x129   : >> { %v423_v34 = vsel %vm407_vm6, %v1718_v13, 64  ;;  %v425_v36 = vsel %vm409_vm7, %v1721_v14, 64  ;;  %v427_v37 = vsel %vm411_vm8, %v1724_v15, 64  ;;  %v429_v39 = vsel %vm413_vm9, %v1727_v16, 64 }
 0x12a   : >> { %vm431_vm10 = vcmp.lt.s32.totalorder %v415_v29, %v419_v31  ;;  %vm433_vm11 = vcmp.lt.s32.totalorder %v417_v30, %v421_v32  ;;  %vm400_vm12 = vcmp.le.f32.partialorder %v1791_v33, %v1814_v28  ;;  %vm402_vm13 = vcmp.le.f32.partialorder %v1793_v35, %v1814_v28 }
 0x12b   : >> { %v432_v40 = vsel %vm431_vm10, %v415_v29, %v419_v31  ;;  %v434_v41 = vsel %vm433_vm11, %v417_v30, %v421_v32  ;;  %vm404_vm14 = vcmp.le.f32.partialorder %v1795_v38, %v1814_v28  ;;  %vm406_vm15 = vcmp.le.f32.partialorder %v1799_v42, %v1814_v28  ;;  %v527_v31 = vld [vmem:[%s526_s18] sm:$0xff]  ;;  %v528_v32 = vld [vmem:[%s526_s18 + $0x8] sm:$0xff] }
 0x12c   : >> { %vm435_vm1 = vcmp.lt.s32.totalorder %v432_v40, %v423_v34  ;;  %vm437_vm2 = vcmp.lt.s32.totalorder %v434_v41, %v425_v36  ;;  %vm408_vm3 = vcmp.le.f32.partialorder %v1803_v46, %v1814_v28  ;;  %vm410_vm4 = vcmp.le.f32.partialorder %v1806_v50, %v1814_v28 }
 0x12d   : >> { %v436_v43 = vsel %vm435_vm1, %v432_v40, %v423_v34  ;;  %v438_v44 = vsel %vm437_vm2, %v434_v41, %v425_v36  ;;  %vm412_vm5 = vcmp.le.f32.partialorder %v1809_v54, %v1814_v28  ;;  %vm414_vm6 = vcmp.le.f32.partialorder %v370_v58, %v1814_v28 }
 0x12e   : >> { %vm439_vm7 = vcmp.lt.s32.totalorder %v436_v43, %v427_v37  ;;  %vm441_vm8 = vcmp.lt.s32.totalorder %v438_v44, %v429_v39  ;;  %v416_v45 = vsel %vm400_vm12, %v1698_v5, 64  ;;  %v418_v46 = vsel %vm402_vm13, %v1709_v10, 64 }
 0x12f   : >> { %v440_v47 = vsel %vm439_vm7, %v436_v43, %v427_v37  ;;  %v442_v48 = vsel %vm441_vm8, %v438_v44, %v429_v39  ;;  %v420_v49 = vsel %vm404_vm14, %v1712_v11, 64  ;;  %v422_v50 = vsel %vm406_vm15, %v1715_v12, 64 }
 0x130   : >> { %vm443_vm9 = vcmp.lt.s32.totalorder %v440_v47, %v442_v48  ;;  %v424_v33 = vsel %vm408_vm3, %v1718_v13, 64  ;;  %v426_v51 = vsel %vm410_vm4, %v1721_v14, 64  ;;  %v428_v35 = vsel %vm412_vm5, %v1724_v15, 64 }
 0x131   : >> { %v444_v52 = vsel %vm443_vm9, %v440_v47, %v442_v48  ;;  %v430_v53 = vsel %vm414_vm6, %v1727_v16, 64  ;;  %vm454_vm10 = vcmp.lt.s32.totalorder %v416_v45, %v420_v49  ;;  %vm456_vm11 = vcmp.lt.s32.totalorder %v418_v46, %v422_v50 }
 0x132   : >> { %v445_v54 = vrot.slane %v444_v52, 4  ;;  %v455_v38 = vsel %vm454_vm10, %v416_v45, %v420_v49  ;;  %v457_v55 = vsel %vm456_vm11, %v418_v46, %v422_v50  ;;  %vm613_vm12 = vcmp.lt.f32.partialorder %v1812_v27, %v1627_v22 }
 0x133   : >> { %vm458_vm13 = vcmp.lt.s32.totalorder %v455_v38, %v424_v33  ;;  %vm460_vm14 = vcmp.lt.s32.totalorder %v457_v55, %v426_v51  ;;  %v1874_v42 = vsel %vm613_vm12, %v1812_v27, %v1627_v22   ;;  %vm2245_vm15 = vcmp.lt.f32.partialorder %v1814_v28, %v1623_v21 }
 0x134   : >> { %vm446_vm1 = vcmp.lt.s32.totalorder %v444_v52, %v445_v54  ;;  %v459_v56 = vsel %vm458_vm13, %v455_v38, %v424_v33  ;;  %v461_v57 = vsel %vm460_vm14, %v457_v55, %v426_v51  ;;  %v1883_v58 = vsel %vm2245_vm15, %v1814_v28, %v1623_v21  }
 0x135   : >> { %v447_v59 = vsel %vm446_vm1, %v444_v52, %v445_v54  ;;  %vm462_vm2 = vcmp.lt.s32.totalorder %v459_v56, %v428_v35  ;;  %vm464_vm3 = vcmp.lt.s32.totalorder %v461_v57, %v430_v53  ;;  %v1634_v30 = vmov 1.0|1.0  }
 0x136   : >> { %v448_v60 = vrot.slane %v447_v59, 2  ;;  %v463_v61 = vsel %vm462_vm2, %v459_v56, %v428_v35  ;;  %v465_v62 = vsel %vm464_vm3, %v461_v57, %v430_v53  ;;  %v2258_v22 = vmov %v1874_v42 }
 0x137   : >> { %vm466_vm4 = vcmp.lt.s32.totalorder %v463_v61, %v465_v62  ;;  %v651_v22 = vrot.slane (%p208_p10), %v1700_v6, 4  ;;  %v698_v35 = vmul.f32 (%p208_p10), %v1702_v7, %v1702_v7 }
 0x138   : >> { %vm449_vm5 = vcmp.lt.s32.totalorder %v447_v59, %v448_v60  ;;  %v467_v63 = vsel %vm466_vm4, %v463_v61, %v465_v62 }
 0x139   : >> { %v450_v0 = vsel %vm449_vm5, %v447_v59, %v448_v60  ;;  %v468_v1 = vrot.slane %v467_v63, 4  ;;  %v702_v57 = vrot.slane (%p208_p10), %v698_v35, 4 }
 0x13a   : >> { %v451_v2 = vrot.slane %v450_v0, 1 }
 0x13b   : >> { %vm469_vm6 = vcmp.lt.s32.totalorder %v467_v63, %v468_v1 }
 0x13c   : >> { %v470_v3 = vsel %vm469_vm6, %v467_v63, %v468_v1  ;;  %vm452_vm7 = vcmp.lt.s32.totalorder %v450_v0, %v451_v2  ;;  %v1102_v1 = vrot.slane (%p208_p10), %v1704_v8, 4 }
 0x13d   : >> { %v471_v4 = vrot.slane %v470_v3, 2  ;;  %v453_v25 = vsel %vm452_vm7, %v450_v0, %v451_v2 }
 0x13e   : >> { %vm477_vm10 = vcmp.eq.s32.totalorder %v1698_v5, %v453_v25  ;;  %vm479_vm11 = vcmp.eq.s32.totalorder %v1709_v10, %v453_v25  ;;  %vm481_vm6 = vcmp.eq.s32.totalorder %v1712_v11, %v453_v25  ;;  %vm483_vm7 = vcmp.eq.s32.totalorder %v1715_v12, %v453_v25 }
 0x13f   : >> { %vm472_vm8 = vcmp.lt.s32.totalorder %v470_v3, %v471_v4  ;;  %vm1453_vm4 = vmpackc.low %vm479_vm11, %vm477_vm10 }
 0x140   : >> { %v473_v24 = vsel %vm472_vm8, %v470_v3, %v471_v4  ;;  %vm1457_vm0 = vmpackc.low %vm483_vm7, %vm481_vm6 }
 0x141   : >> { %v474_v26 = vrot.slane %v473_v24, 1 }
 0x143   : >> { %vm475_vm9 = vcmp.lt.s32.totalorder %v473_v24, %v474_v26 }
 0x144   : >> { %v476_v29 = vsel %vm475_vm9, %v473_v24, %v474_v26 }
 0x145   : >> { %vm478_vm13 = vcmp.eq.s32.totalorder %v1698_v5, %v476_v29  ;;  %vm480_vm14 = vcmp.eq.s32.totalorder %v1709_v10, %v476_v29  ;;  %vm482_vm1 = vcmp.eq.s32.totalorder %v1712_v11, %v476_v29  ;;  %vm484_vm2 = vcmp.eq.s32.totalorder %v1715_v12, %v476_v29 }
 0x146   : >> { %vm1451_vm3 = vmpackc.low %vm480_vm14, %vm478_vm13  ;;  %vm486_vm8 = vcmp.eq.s32.totalorder %v1718_v13, %v476_v29  ;;  %vm488_vm9 = vcmp.eq.s32.totalorder %v1721_v14, %v476_v29  ;;  %vm485_vm13 = vcmp.eq.s32.totalorder %v1718_v13, %v453_v25  ;;  %vm487_vm14 = vcmp.eq.s32.totalorder %v1721_v14, %v453_v25 }
 0x147   : >> { %1452 = vmatprep.subr.msk.bf16.mxu1 %vm1451_vm3, %v1634_v30  ;;  %vm1455_vm5 = vmpackc.low %vm484_vm2, %vm482_vm1  ;;  %vm490_vm10 = vcmp.eq.s32.totalorder %v1724_v15, %v476_v29  ;;  %vm492_vm11 = vcmp.eq.s32.totalorder %v1727_v16, %v476_v29  ;;  %vm489_vm3 = vcmp.eq.s32.totalorder %v1724_v15, %v453_v25 }
 0x148   : >> { %1454 = vmatpush1.bf16.msk.msra.mxu1 %vm1453_vm4, %v1634_v30  ;;  %vm1459_vm15 = vmpackc.low %vm488_vm9, %vm486_vm8  ;;  %vm491_vm4 = vcmp.eq.s32.totalorder %v1727_v16, %v453_v25  ;;  %vm1184_vm8 = vcmask (%p208_p10), 1040384   ;;  %vm1187_vm9 = vcmask (%p208_p10), 1041408  }
 0x149   : >> { %1456 = vmatprep.subr.msk.bf16.mxu1 %vm1455_vm5, %v1634_v30  ;;  %vm1461_vm1 = vmpackc.low %vm487_vm14, %vm485_vm13  ;;  %vm2248_vm5 = vcmp.lt.f32.partialorder %v1814_v28, %v1623_v21  ;;  %v2257_v21 = vmov %v1883_v58  ;;  %v697_v28 = vmul.f32 (%p208_p10), %v1700_v6, %v1700_v6  ;;  %vm1190_vm13 = vcmask (%p208_p10), 1042432  }
 0x14a   : >> { %vm1463_vm2 = vmpackc.low %vm492_vm11, %vm490_vm10  ;;  %vm1195_vm14 = vcmask (%p208_p10), 1044480   ;;  %vm1198_vm10 = vcmask (%p208_p10), 1045504   ;;  %vm1201_vm11 = vcmask (%p208_p10), 1046528  }
 0x14b   : >> { %vm2251_vm6 = vmmov %vm2248_vm5  ;;  %v701_v11 = vrot.slane (%p208_p10), %v697_v28, 4 }
 0x14c   : >> { %1458 = vmatpush1.bf16.msk.msra.mxu1 %vm1457_vm0, %v1634_v30  ;;  %vm1465_vm0 = vmpackc.low %vm491_vm4, %vm489_vm3 }
 0x14d   : >> { %1460 = vmatprep.subr.msk.bf16.mxu1 %vm1459_vm15, %v1634_v30  ;;  %vm529_vm15 = vcmask 523264  }
 0x150   : >> { %1462 = vmatpush1.bf16.msk.msra.mxu1 %vm1461_vm1, %v1634_v30 }
 0x151   : >> { %1464 = vmatprep.subr.msk.bf16.mxu1 %vm1463_vm2, %v1634_v30 }
 0x154   : >> { %1466 = vmatpush1.bf16.msk.msra.mxu1 %vm1465_vm0, %v1634_v30 }
 0x157   : >> { %1442 = vmatmul.mubr.msk.f32.vlgmr.msra.gmra.mrb[0].mxu1 %vm529_vm15, %v527_v31 }
 0x158   : >> { %606 = vmatprep.mubr.f32.mxu1 %v1633_v23 }
 0x15b   : >> { %1443 = vmatmul.mubr.msk.f32.gmra.mrb[2].mxu1 %vm529_vm15, %v528_v32 }
 0x22a   : >> { %v602_v34 = vpop.f32.mrb[0].mxu1 }
 0x22b   : >> { %v1910_v20 = vsel %vm613_vm12, %v602_v34, %v1619_v20   ;;  %v604_v37 = vpop.f32.mrb[1].mxu1 }
 0x22c   : >> { %v2247_v36 = vmov %v1910_v20  ;;  %v1916_v19 = vsel %vm2248_vm5, %v604_v37, %v1615_v19   ;;  %210 = sbr.rel (!%p208_p10) target bundleno = 35 (0x23), region = 122 }
 0x22d   : >> { %v2249_v39 = vmov %v1916_v19  ;;  %v2256_v20 = vmov %v2247_v36  ;;  %1138 = vst [vmem:[%s1729_s5] sm:$0xff] (%p208_p10), %v2247_v36  ;;  %v625_v27 = vmul.f32 (%p208_p10), %v2247_v36, %v1700_v6  ;;  %v655_v5 = vmul.f32 (%p208_p10), %v651_v22, %v2247_v36 }
 0x22e   : >> { %v608_v40 = vpop.f32.mrb[2].mxu1  ;;  %v2255_v19 = vmov %v2249_v39  ;;  %1139 = vst [vmem:[%s1729_s5 + $0x8] sm:$0xff] (%p208_p10), %v2249_v39  ;;  %v644_v56 = vrot.slane (%p208_p10), %v2249_v39, 3  ;;  %v1084_v61 = vmul.f32 (%p208_p10), %v2247_v36, %v1704_v8 }
 0x22f   : >> { %v1922_v18 = vsel %vm613_vm12, %v608_v40, %v1611_v18   ;;  %v610_v41 = vpop.f32.mrb[3].mxu1  ;;  %v659_v12 = vrot.slane (%p208_p10), %v655_v5, 1  ;;  %v629_v13 = vrot.slane (%p208_p10), %v625_v27, 1  ;;  %vm2259_vm12 = vcmask (%p208_p10), 1043456  }
 0x230   : >> { %v2250_v23 = vmov %v1922_v18  ;;  %v1928_v17 = vsel %vm2251_vm6, %v610_v41, %v1607_v17   ;;  %v706_v14 = vsel (%p208_p10), %vm2259_vm12, %v701_v11, 0.0  ;;  %v652_v19 = vrot.slane (%p208_p10), %v1702_v7, 4  ;;  %vm2260_vm7 = vmmov (%p208_p10), %vm2259_vm12 }
 0x231   : >> { %v2252_v43 = vmov %v1928_v17  ;;  %v2254_v18 = vmov %v2250_v23  ;;  %1140 = vst [vmem:[%s1729_s5 + $0x10] sm:$0xff] (%p208_p10), %v2250_v23  ;;  %v673_v10 = vmul.f32 (%p208_p10), %v2250_v23, %v1700_v6  ;;  %v707_v16 = vrot.slane (%p208_p10), %v706_v14, 4  ;;  %vm2261_vm1 = vmmov (%p208_p10), %vm2260_vm7 }
 0x232   : >> { %v2253_v17 = vmov %v2252_v43  ;;  %1141 = vst [vmem:[%s1729_s5 + $0x18] sm:$0xff] (%p208_p10), %v2252_v43  ;;  %v643_v18 = vrot.slane (%p208_p10), %v2247_v36, 3  ;;  %v635_v20 = vrot.slane (%p208_p10), %v625_v27, 2  ;;  %v663_v21 = vadd.f32 (%p208_p10), %v659_v12, %v655_v5  ;;  %vm2262_vm2 = vmmov (%p208_p10), %vm2261_vm1 }
 0x233   : > { %v677_v15 = vrot.slane %v673_v10, 1  ;;  %v626_v17 = vmul.f32 %v2249_v39, %v1702_v7  ;;  %v665_v44 = vrot.slane %v655_v5, 2  ;;  %v708_v45 = vadd.f32 %v707_v16, %v706_v14  ;;  %vm2266_vm3 = vmmov %vm2261_vm1  ;;  %s1450_s21 = sshll.u32 (%p1685_p5), %s1388_s15, 4 }
 0x234   : > { %v633_v46 = vadd.f32 %v629_v13, %v625_v27  ;;  %v683_v47 = vrot.slane %v673_v10, 2  ;;  %v656_v48 = vmul.f32 %v652_v19, %v2249_v39  ;;  %v674_v49 = vmul.f32 %v2252_v43, %v1702_v7  ;;  %vm2268_vm4 = vmmov %vm2261_vm1  ;;  %s1273_s24 = scalar_lea.vmem (%p1685_p5), %s2243_s3, %s1450_s21 }
 0x235   : > { %v681_v50 = vadd.f32 %v677_v15, %v673_v10  ;;  %v709_v33 = vrot.slane %v708_v45, 2  ;;  %v630_v51 = vrot.slane %v626_v17, 1  ;;  %v636_v52 = vrot.slane %v626_v17, 2 }
 0x236   : > { %v660_v53 = vrot.slane %v656_v48, 1  ;;  %v666_v54 = vrot.slane %v656_v48, 2  ;;  %v678_v38 = vrot.slane %v674_v49, 1  ;;  %v669_v55 = vadd.f32 %v665_v44, %v663_v21 }
 0x237   : > { %v710_v42 = vadd.f32 %v709_v33, %v708_v45  ;;  %v684_v60 = vrot.slane %v674_v49, 2  ;;  %v634_v63 = vadd.f32 %v630_v51, %v626_v17  ;;  %v713_v0 = vsel %vm2260_vm7, %v702_v57, 0.0 }
 0x238   : > { %v664_v58 = vadd.f32 %v660_v53, %v656_v48  ;;  %v682_v59 = vadd.f32 %v678_v38, %v674_v49  ;;  %v691_v2 = vrot.slane %v2250_v23, 3  ;;  %v714_v4 = vrot.slane %v713_v0, 4 }
 0x239   : > { %v711_v62 = vrot.slane %v710_v42, 1  ;;  %v639_v24 = vadd.f32 %v635_v20, %v633_v46  ;;  %v687_v25 = vadd.f32 %v683_v47, %v681_v50  ;;  %v692_v29 = vrot.slane %v2252_v43, 3 }
 0x23a   : > { %v670_v3 = vadd.f32 %v666_v54, %v664_v58  ;;  %v671_v30 = vadd.f32 %v669_v55, %v643_v18  ;;  %v688_v31 = vadd.f32 %v684_v60, %v682_v59  ;;  %v715_v32 = vadd.f32 %v714_v4, %v713_v0 }
 0x23b   : > { %v712_v26 = vadd.f32 %v711_v62, %v710_v42  ;;  %v1088_v34 = vrot.slane %v1084_v61, 1  ;;  %v640_v37 = vadd.f32 %v636_v52, %v634_v63  ;;  %v1106_v41 = vmul.f32 %v1102_v1, %v2247_v36 }
 0x23c   : > { %v672_v40 = vadd.f32 %v670_v3, %v644_v56  ;;  %v647_v22 = vadd.f32 %v643_v18, %v639_v24  ;;  %v695_v27 = vadd.f32 %v691_v2, %v687_v25  ;;  %v716_v28 = vrot.slane %v715_v32, 2 }
 0x23d   : > { %1549 = vrsqrt.f32 %v712_v26  ;;  %v1122_v5 = vmul.f32 %v2250_v23, %v1704_v8  ;;  %v1144_v10 = vrot.slane %v671_v30, 3  ;;  %v696_v11 = vadd.f32 %v692_v29, %v688_v31 }
 0x23e   : > { %v1092_v12 = vadd.f32 %v1088_v34, %v1084_v61  ;;  %v1094_v13 = vrot.slane %v1084_v61, 2  ;;  %v648_v14 = vadd.f32 %v644_v56, %v640_v37  ;;  %v1145_v15 = vrot.slane %v672_v40, 3 }
 0x23f   : > { %v1110_v16 = vrot.slane %v1106_v41, 1  ;;  %v1150_v17 = vrot.slane %v695_v27, 6  ;;  %v717_v19 = vadd.f32 %v716_v28, %v715_v32  ;;  %v1126_v20 = vrot.slane %v1122_v5, 1 }
 0x240   : > { %v1185_v21 = vsel %vm1184_vm8, %v647_v22, %v1144_v10  ;;  %v1151_v18 = vrot.slane %v696_v11, 6  ;;  %v1988_v44 = vadd.f32 %v1094_v13, %v1092_v12  ;;  %v1116_v45 = vrot.slane %v1106_v41, 2 }
 0x241   : > { %v1186_v8 = vsel %vm1184_vm8, %v648_v14, %v1145_v15  ;;  %v1114_v46 = vadd.f32 %v1110_v16, %v1106_v41  ;;  %v1993_v47 = vmul.f32 %v2249_v39, %v1706_v9  ;;  %v1103_v48 = vrot.slane %v1706_v9, 4 }
 0x242   : > { %v718_v50 = vrot.slane %v717_v19, 1  ;;  %v1130_v33 = vadd.f32 %v1126_v20, %v1122_v5  ;;  %v1132_v51 = vrot.slane %v1122_v5, 2  ;;  %v1998_v52 = vsel %vm1187_vm9, %v1185_v21, %v1150_v17 }
 0x243   : > { %v2001_v53 = vsel %vm1187_vm9, %v1186_v8, %v1151_v18  ;;  %v2003_v54 = vadd.f32 %v1116_v45, %v1114_v46  ;;  %v1089_v55 = vrot.slane %v1993_v47, 1  ;;  %v2008_v42 = vmul.f32 %v1103_v48, %v2249_v39 }
 0x244   : > { %v2010_v60 = vadd.f32 %v1132_v51, %v1130_v33  ;;  %v2015_v62 = vmul.f32 %v2252_v43, %v1706_v9 }
 0x245   : > { %v2019_v24 = vadd.f32 %v1089_v55, %v1993_v47  ;;  %v1111_v25 = vrot.slane %v2008_v42, 1 }
 0x246   : > { %v1127_v34 = vrot.slane %v2015_v62, 1 }
 0x247   : > { %v1550_v49 = vpop.eup %1549 }
 0x248   : > { %v722_v35 = vmul.f32 %v1550_v49, %v1700_v6  ;;  %v719_v6 = vadd.f32 %v718_v50, %v717_v19 }
 0x24a   : > { %v724_v56 = vmul.f32 %v722_v35, %v722_v35  ;;  %v740_v57 = vrot.slane %v722_v35, 1  ;;  %v746_v58 = vrot.slane %v722_v35, 3  ;;  %v762_v59 = vrot.slane %v722_v35, 2 }
 0x24b   : > { %1551 = vrsqrt.f32 %v719_v6 }
 0x24c   : > { %v728_v63 = vrot.slane %v724_v56, 1  ;;  %v744_v0 = vmul.f32 %v740_v57, %v722_v35  ;;  %v750_v1 = vmul.f32 %v746_v58, %v722_v35  ;;  %v766_v2 = vmul.f32 %v762_v59, %v722_v35 }
 0x24d   : > { %v782_v3 = vrot.slane %v724_v56, 2 }
 0x24e   : > { %v732_v26 = vadd.f32 %v728_v63, %v724_v56  ;;  %v754_v29 = vrot.slane %v750_v1, 7  ;;  %v770_v30 = vrot.slane %v766_v2, 7  ;;  %v794_v31 = vrot.slane %v744_v0, 6 }
 0x24f   : > { %v786_v32 = vadd.f32 %v782_v3, %v724_v56 }
 0x250   : > { %v734_v37 = vmul.f32 2.0, %v732_v26  ;;  %v758_v40 = vsub.f32 %v744_v0, %v754_v29  ;;  %v774_v41 = vadd.f32 %v770_v30, %v766_v2  ;;  %v778_v22 = vadd.f32 %v754_v29, %v744_v0 }
 0x251   : > { %v788_v27 = vmul.f32 2.0, %v786_v32  ;;  %v798_v28 = vsub.f32 %v744_v0, %v794_v31  ;;  %v802_v5 = vsub.f32 %v766_v2, %v770_v30  ;;  %v806_v10 = vadd.f32 %v794_v31, %v744_v0 }
 0x252   : > { %v2024_v11 = vsub.f32 1.0, %v734_v37  ;;  %v2026_v12 = vmul.f32 2.0, %v758_v40  ;;  %v2028_v13 = vmul.f32 2.0, %v774_v41  ;;  %v780_v14 = vmul.f32 2.0, %v778_v22 }
 0x253   : > { %v790_v15 = vsub.f32 1.0, %v788_v27  ;;  %v2030_v16 = vmul.f32 2.0, %v798_v28  ;;  %v804_v17 = vmul.f32 2.0, %v802_v5  ;;  %v2032_v19 = vmul.f32 2.0, %v806_v10 }
 0x254   : > { %v812_v20 = vrot.slane %v2024_v11, 6  ;;  %v820_v21 = vrot.slane %v780_v14, 4  ;;  %v852_v18 = vrot.slane %v2026_v12, 5  ;;  %v892_v45 = vrot.slane %v2028_v13, 5 }
 0x255   : > { %v836_v8 = vrot.slane %v804_v17, 3  ;;  %v860_v46 = vrot.slane %v790_v15, 4  ;;  %v876_v48 = vrot.slane %v2032_v19, 4  ;;  %v900_v49 = vrot.slane %v2030_v16, 5  ;;  %v1552_v1 = vpop.eup %1551 }
 0x256   : > { %v816_v50 = vmul.f32 %v812_v20, %v2247_v36  ;;  %v824_v33 = vmul.f32 %v820_v21, %v2247_v36  ;;  %v856_v51 = vmul.f32 %v852_v18, %v2247_v36  ;;  %v896_v35 = vmul.f32 %v892_v45, %v2247_v36 }
 0x257   : > { %v840_v55 = vmul.f32 %v836_v8, %v2247_v36  ;;  %v864_v56 = vmul.f32 %v860_v46, %v2247_v36  ;;  %v880_v57 = vmul.f32 %v876_v48, %v2247_v36  ;;  %v904_v58 = vmul.f32 %v900_v49, %v2247_v36 }
 0x258   : > { %v828_v59 = vrot.slane %v824_v33, 1  ;;  %v914_v6 = vrot.slane %v2024_v11, 3  ;;  %v928_v63 = vrot.slane %v2024_v11, 2  ;;  %v934_v0 = vmul.f32 %v780_v14, %v2247_v36 }
 0x259   : > { %v844_v2 = vrot.slane %v840_v55, 2  ;;  %v868_v3 = vrot.slane %v864_v56, 1  ;;  %v884_v26 = vrot.slane %v880_v57, 2  ;;  %v908_v29 = vrot.slane %v904_v58, 1 }
 0x25a   : > { %v832_v30 = vadd.f32 %v828_v59, %v816_v50  ;;  %v918_v31 = vmul.f32 %v914_v6, %v2247_v36  ;;  %v932_v32 = vmul.f32 %v928_v63, %v2247_v36  ;;  %v938_v37 = vrot.slane %v934_v0, 1 }
 0x25b   : > { %v872_v40 = vadd.f32 %v868_v3, %v856_v51  ;;  %v912_v41 = vadd.f32 %v908_v29, %v896_v35  ;;  %v944_v22 = vrot.slane %v804_v17, 7  ;;  %v958_v27 = vrot.slane %v2026_v12, 1 }
 0x25c   : > { %v848_v28 = vadd.f32 %v844_v2, %v832_v30  ;;  %v922_v5 = vrot.slane %v918_v31, 2  ;;  %v942_v10 = vadd.f32 %v938_v37, %v932_v32  ;;  %v964_v14 = vmul.f32 %v790_v15, %v2247_v36 }
 0x25d   : > { %v888_v50 = vadd.f32 %v884_v26, %v872_v40  ;;  %v948_v33 = vmul.f32 %v944_v22, %v2247_v36  ;;  %v962_v55 = vmul.f32 %v958_v27, %v2247_v36  ;;  %v974_v56 = vmul.f32 %v2032_v19, %v2247_v36 }
 0x25e   : > { %v926_v51 = vadd.f32 %v922_v5, %v912_v41  ;;  %v968_v17 = vrot.slane %v964_v14, 1  ;;  %v984_v12 = vrot.slane %v2028_v13, 1  ;;  %v990_v35 = vrot.slane %v2030_v16, 1 }
 0x25f   : > { %v952_v57 = vrot.slane %v948_v33, 2  ;;  %v978_v58 = vrot.slane %v974_v56, 2  ;;  %v1020_v15 = vmul.f32 %v820_v21, %v2250_v23  ;;  %v1030_v59 = vmul.f32 %v836_v8, %v2250_v23 }
 0x260   : > { %v972_v63 = vadd.f32 %v968_v17, %v962_v55  ;;  %v988_v0 = vmul.f32 %v984_v12, %v2247_v36  ;;  %v994_v2 = vmul.f32 %v990_v35, %v2247_v36  ;;  %v2075_v19 = vadd.f32 %v1111_v25, %v2008_v42 }
 0x261   : > { %v956_v3 = vadd.f32 %v952_v57, %v942_v10  ;;  %v1024_v26 = vrot.slane %v1020_v15, 1  ;;  %v1040_v29 = vmul.f32 %v852_v18, %v2250_v23  ;;  %v1042_v30 = vmul.f32 %v860_v46, %v2250_v23 }
 0x262   : > { %v982_v31 = vadd.f32 %v978_v58, %v972_v63  ;;  %v998_v21 = vrot.slane %v994_v2, 1  ;;  %v1034_v32 = vrot.slane %v1030_v59, 2  ;;  %v1156_v8 = vrot.slane %v848_v28, 5 }
 0x263   : > { %v2080_v37 = vmul.f32 %v876_v48, %v2250_v23  ;;  %v1162_v40 = vrot.slane %v888_v50, 4  ;;  %v1168_v41 = vrot.slane %v926_v51, 3  ;;  %v1174_v22 = vrot.slane %v956_v3, 6 }
 0x264   : > { %v1046_v27 = vrot.slane %v1042_v30, 1  ;;  %v1180_v5 = vrot.slane %v982_v31, 5  ;;  %v1191_v25 = vsel %vm1190_vm13, %v1998_v52, %v1156_v8  ;;  %v723_v10 = vmul.f32 %v1552_v1, %v1702_v7 }
 0x265   : > { %v1193_v18 = vsel %vm2261_vm1, %v1191_v25, %v1162_v40  ;;  %v1002_v46 = vadd.f32 %v998_v21, %v988_v0  ;;  %v1004_v14 = vrot.slane %v2024_v11, 7  ;;  %v1018_v48 = vmul.f32 %v812_v20, %v2250_v23 }
 0x266   : > { %v1196_v28 = vsel %vm1195_vm14, %v1193_v18, %v1168_v41  ;;  %v725_v50 = vmul.f32 %v723_v10, %v723_v10  ;;  %v741_v33 = vrot.slane %v723_v10, 1  ;;  %v747_v55 = vrot.slane %v723_v10, 3 }
 0x267   : > { %v1199_v56 = vsel %vm1198_vm10, %v1196_v28, %v1174_v22  ;;  %v763_v52 = vrot.slane %v723_v10, 2  ;;  %v1008_v7 = vmul.f32 %v1004_v14, %v2247_v36  ;;  %v1028_v1 = vadd.f32 %v1024_v26, %v1018_v48 }
 0x268   : > { %v1202_v51 = vsel %vm1201_vm11, %v1199_v56, %v1180_v5  ;;  %v729_v17 = vrot.slane %v725_v50, 1  ;;  %v745_v12 = vmul.f32 %v741_v33, %v723_v10  ;;  %v751_v35 = vmul.f32 %v747_v55, %v723_v10 }
 0x269   : > { %v1056_v57 = vrot.slane %v2080_v37, 2  ;;  %1204 = vst [vmem:[%s1729_s5 + $0x20] sm:$0xff] %v1202_v51  ;;  %v767_v20 = vmul.f32 %v763_v52, %v723_v10  ;;  %v783_v58 = vrot.slane %v725_v50, 2  ;;  %v1012_v15 = vrot.slane %v1008_v7, 2 }
 0x26a   : > { %v733_v59 = vadd.f32 %v729_v17, %v725_v50  ;;  %v755_v63 = vrot.slane %v751_v35, 7  ;;  %v795_v0 = vrot.slane %v745_v12, 6  ;;  %v2096_v2 = vadd.f32 %v1034_v32, %v1028_v1 }
 0x26b   : > { %v771_v3 = vrot.slane %v767_v20, 7  ;;  %v787_v30 = vadd.f32 %v783_v58, %v725_v50  ;;  %v2098_v36 = vadd.f32 %v1012_v15, %v1002_v46  ;;  %v2100_v26 = vadd.f32 %v1046_v27, %v1040_v29 }
 0x26c   : > { %v735_v31 = vmul.f32 2.0, %v733_v59  ;;  %v759_v21 = vsub.f32 %v745_v12, %v755_v63  ;;  %v779_v8 = vadd.f32 %v755_v63, %v745_v12  ;;  %v799_v40 = vsub.f32 %v745_v12, %v795_v0 }
 0x26d   : > { %v775_v41 = vadd.f32 %v771_v3, %v767_v20  ;;  %v789_v22 = vmul.f32 2.0, %v787_v30  ;;  %v803_v5 = vsub.f32 %v767_v20, %v771_v3  ;;  %v807_v25 = vadd.f32 %v795_v0, %v745_v12 }
 0x26e   : > { %v2102_v10 = vsub.f32 1.0, %v735_v31  ;;  %v2104_v18 = vmul.f32 2.0, %v759_v21  ;;  %v781_v32 = vmul.f32 2.0, %v779_v8  ;;  %v2106_v14 = vmul.f32 2.0, %v799_v40 }
 0x26f   : > { %v2108_v48 = vmul.f32 2.0, %v775_v41  ;;  %v791_v46 = vsub.f32 1.0, %v789_v22  ;;  %v805_v29 = vmul.f32 2.0, %v803_v5  ;;  %v809_v27 = vmul.f32 2.0, %v807_v25 }
 0x270   : > { %v813_v28 = vrot.slane %v2102_v10, 6  ;;  %v821_v50 = vrot.slane %v781_v32, 4  ;;  %v853_v33 = vrot.slane %v2104_v18, 5  ;;  %v901_v55 = vrot.slane %v2106_v14, 5 }
 0x271   : > { %v837_v56 = vrot.slane %v805_v29, 3  ;;  %v861_v52 = vrot.slane %v791_v46, 4  ;;  %v877_v7 = vrot.slane %v809_v27, 4  ;;  %v893_v1 = vrot.slane %v2108_v48, 5 }
 0x272   : > { %v817_v51 = vmul.f32 %v813_v28, %v2249_v39  ;;  %v825_v17 = vmul.f32 %v821_v50, %v2249_v39  ;;  %v857_v12 = vmul.f32 %v853_v33, %v2249_v39  ;;  %v905_v35 = vmul.f32 %v901_v55, %v2249_v39 }
 0x273   : > { %v841_v20 = vmul.f32 %v837_v56, %v2249_v39  ;;  %v865_v58 = vmul.f32 %v861_v52, %v2249_v39  ;;  %v881_v15 = vmul.f32 %v877_v7, %v2249_v39  ;;  %v897_v59 = vmul.f32 %v893_v1, %v2249_v39 }
 0x274   : > { %v829_v63 = vrot.slane %v825_v17, 1  ;;  %v909_v0 = vrot.slane %v905_v35, 1  ;;  %v915_v3 = vrot.slane %v2102_v10, 3  ;;  %v929_v30 = vrot.slane %v2102_v10, 2 }
 0x275   : > { %v845_v31 = vrot.slane %v841_v20, 2  ;;  %v869_v21 = vrot.slane %v865_v58, 1  ;;  %v885_v8 = vrot.slane %v881_v15, 2  ;;  %v935_v40 = vmul.f32 %v781_v32, %v2249_v39 }
 0x276   : > { %v833_v41 = vadd.f32 %v829_v63, %v817_v51  ;;  %v913_v22 = vadd.f32 %v909_v0, %v897_v59  ;;  %v919_v5 = vmul.f32 %v915_v3, %v2249_v39  ;;  %v933_v25 = vmul.f32 %v929_v30, %v2249_v39 }
 0x277   : > { %v873_v4 = vadd.f32 %v869_v21, %v857_v12  ;;  %v939_v17 = vrot.slane %v935_v40, 1  ;;  %v945_v35 = vrot.slane %v805_v29, 7  ;;  %v959_v38 = vrot.slane %v2104_v18, 1 }
 0x278   : > { %v849_v9 = vadd.f32 %v845_v31, %v833_v41  ;;  %v923_v61 = vrot.slane %v919_v5, 2  ;;  %v965_v20 = vmul.f32 %v791_v46, %v2249_v39  ;;  %v975_v58 = vmul.f32 %v809_v27, %v2249_v39 }
 0x279   : > { %v889_v32 = vadd.f32 %v885_v8, %v873_v4  ;;  %v943_v51 = vadd.f32 %v939_v17, %v933_v25  ;;  %v949_v15 = vmul.f32 %v945_v35, %v2249_v39  ;;  %v963_v59 = vmul.f32 %v959_v38, %v2249_v39 }
 0x27a   : > { %v927_v63 = vadd.f32 %v923_v61, %v913_v22  ;;  %v969_v0 = vrot.slane %v965_v20, 1  ;;  %v979_v30 = vrot.slane %v975_v58, 2  ;;  %v985_v12 = vrot.slane %v2108_v48, 1 }
 0x27b   : > { %v953_v29 = vrot.slane %v949_v15, 2  ;;  %v991_v18 = vrot.slane %v2106_v14, 1  ;;  %v1021_v31 = vmul.f32 %v821_v50, %v2252_v43  ;;  %v1031_v46 = vmul.f32 %v837_v56, %v2252_v43 }
 0x27c   : > { %v973_v21 = vadd.f32 %v969_v0, %v963_v59  ;;  %v989_v4 = vmul.f32 %v985_v12, %v2249_v39  ;;  %v1043_v27 = vmul.f32 %v861_v52, %v2252_v43  ;;  %v1062_v38 = vmul.f32 %v892_v45, %v2250_v23 }
 0x27d   : > { %v957_v61 = vadd.f32 %v953_v29, %v943_v51  ;;  %v995_v8 = vmul.f32 %v991_v18, %v2249_v39  ;;  %v1025_v40 = vrot.slane %v1021_v31, 1  ;;  %v1041_v41 = vmul.f32 %v853_v33, %v2252_v43 }
 0x27e   : > { %v983_v22 = vadd.f32 %v979_v30, %v973_v21  ;;  %v1035_v5 = vrot.slane %v1031_v46, 2  ;;  %v1053_v50 = vmul.f32 %v877_v7, %v2252_v43  ;;  %v1157_v56 = vrot.slane %v849_v9, 5 }
 0x27f   : > { %v1047_v25 = vrot.slane %v1043_v27, 1  ;;  %v1163_v17 = vrot.slane %v889_v32, 4  ;;  %v1169_v35 = vrot.slane %v927_v63, 3  ;;  %v1175_v20 = vrot.slane %v957_v61, 6 }
 0x280   : > { %v999_v52 = vrot.slane %v995_v8, 1  ;;  %v1181_v58 = vrot.slane %v983_v22, 5  ;;  %v1192_v13 = vsel %vm1190_vm13, %v2001_v53, %v1157_v56  ;;  %v1060_v45 = vadd.f32 %v1056_v57, %v2100_v26 }
 0x281   : > { %v1194_v33 = vsel %vm2262_vm2, %v1192_v13, %v1163_v17  ;;  %v1064_v9 = vmul.f32 %v900_v49, %v2250_v23  ;;  %v1074_v7 = vmul.f32 %v914_v6, %v2250_v23  ;;  %v1208_v32 = vrot.slane %v2098_v36, 4 }
 0x282   : > { %v1057_v51 = vrot.slane %v1053_v50, 2  ;;  %v1197_v53 = vsel %vm1195_vm14, %v1194_v33, %v1169_v35  ;;  %v1214_v15 = vrot.slane %v2096_v2, 7  ;;  %v1220_v37 = vrot.slane %v1060_v45, 6  ;;  %v1286_v45 = vld [vmem:[%s1729_s5] sm:$0xff] (%p1685_p5)  ;;  %v1288_v33 = vld [vmem:[%s1729_s5 + $0x8] sm:$0xff] (%p1685_p5) }
 0x283   : > { %v1200_v57 = vsel %vm1198_vm10, %v1197_v53, %v1175_v20  ;;  %v1068_v26 = vrot.slane %v1064_v9, 1  ;;  %v1078_v59 = vrot.slane %v1074_v7, 2  ;;  %v1005_v16 = vrot.slane %v2102_v10, 7  ;;  %v1290_v9 = vld [vmem:[%s1729_s5 + $0x10] sm:$0xff] (%p1685_p5)  ;;  %v1292_v7 = vld [vmem:[%s1729_s5 + $0x18] sm:$0xff] (%p1685_p5)  ;;  %1287 = vst [vmem:[%s1273_s24] sm:$0xff] (%p1685_p5), %v1286_v45  ;;  %1289 = vst [vmem:[%s1273_s24 + $0x8] sm:$0xff] (%p1685_p5), %v1288_v33 }
 0x284   : > { %v1203_v49 = vsel %vm1201_vm11, %v1200_v57, %v1181_v58  ;;  %v1003_v63 = vadd.f32 %v999_v52, %v989_v4  ;;  %v1019_v23 = vmul.f32 %v813_v28, %v2252_v43  ;;  %v1051_v11 = vadd.f32 %v1047_v25, %v1041_v41  ;;  %1291 = vst [vmem:[%s1273_s24 + $0x20] sm:$0xff] (%p1685_p5), %v1290_v9 }
 0x285   : > { %1205 = vst [vmem:[%s1729_s5 + $0x28] sm:$0xff] %v1203_v49  ;;  %v1072_v6 = vadd.f32 %v1068_v26, %v1062_v38  ;;  %v1248_v36 = vsel %vm1184_vm8, %v1208_v32, %v1214_v15  ;;  %v1009_v2 = vmul.f32 %v1005_v16, %v2249_v39  ;;  %v1063_v0 = vmul.f32 %v893_v1, %v2252_v43  ;;  %v1294_v32 = vld [vmem:[%s1729_s5 + $0x20] sm:$0xff] (%p1685_p5) }
 0x286   : > { %v1029_v30 = vadd.f32 %v1025_v40, %v1019_v23  ;;  %v1061_v12 = vadd.f32 %v1057_v51, %v1051_v11  ;;  %v1065_v29 = vmul.f32 %v901_v55, %v2252_v43  ;;  %v1075_v28 = vmul.f32 %v915_v3, %v2252_v43  ;;  %1293 = vst [vmem:[%s1273_s24 + $0x28] sm:$0xff] (%p1685_p5), %v1292_v7 }
 0x287   : > { %v1082_v18 = vadd.f32 %v1078_v59, %v1072_v6  ;;  %v1013_v31 = vrot.slane %v1009_v2, 2  ;;  %v1131_v39 = vadd.f32 %v1127_v34, %v2015_v62  ;;  %v1133_v46 = vrot.slane %v2015_v62, 2  ;;  %1295 = vst [vmem:[%s1273_s24 + $0x40] sm:$0xff] (%p1685_p5), %v1294_v32 }
 0x288   : > { %v1250_v48 = vsel %vm1187_vm9, %v1248_v36, %v1220_v37  ;;  %v1039_v1 = vadd.f32 %v1035_v5, %v1029_v30  ;;  %v1069_v21 = vrot.slane %v1065_v29, 1  ;;  %v1079_v4 = vrot.slane %v1075_v28, 2 }
 0x289   : > { %v1226_v27 = vrot.slane %v1082_v18, 5  ;;  %v1244_v14 = vrot.slane %v2010_v60, 2  ;;  %v1017_v55 = vadd.f32 %v1013_v31, %v1003_v63  ;;  %v2263_v43 = vrot.slane %v1993_v47, 2 }
 0x28a   : > { %v1073_v3 = vadd.f32 %v1069_v21, %v1063_v0  ;;  %v2264_v38 = vrot.slane %v2008_v42, 2  ;;  %v1215_v61 = vrot.slane %v1039_v1, 7  ;;  %v1221_v62 = vrot.slane %v1061_v12, 6 }
 0x28b   : > { %v1099_v10 = vadd.f32 %v2263_v43, %v2019_v24  ;;  %v1252_v8 = vsel %vm1190_vm13, %v1250_v48, %v1226_v27  ;;  %v1137_v40 = vadd.f32 %v1133_v46, %v1131_v39  ;;  %v1209_v41 = vrot.slane %v1017_v55, 4 }
 0x28c   : > { %v1121_v34 = vadd.f32 %v2264_v38, %v2075_v19  ;;  %v2265_v22 = vrot.slane %v1988_v44, 4  ;;  %v1083_v5 = vadd.f32 %v1079_v4, %v1073_v3  ;;  %v2267_v47 = vrot.slane %v2003_v54, 7  ;;  %v1296_v51 = vld [vmem:[%s1729_s5 + $0x28] sm:$0xff] (%p1685_p5) }
 0x28d   : > { %v1233_v50 = vrot.slane %v1099_v10, 4  ;;  %v1249_v42 = vsel %vm1184_vm8, %v1209_v41, %v1215_v61  ;;  %v1245_v44 = vrot.slane %v1137_v40, 2  ;;  %1297 = vst [vmem:[%s1273_s24 + $0x48] sm:$0xff] (%p1685_p5), %v1296_v51 }
 0x28e   : > { %v1254_v60 = vsel %vm2266_vm3, %v1252_v8, %v2265_v22  ;;  %v1227_v56 = vrot.slane %v1083_v5, 5  ;;  %v1239_v25 = vrot.slane %v1121_v34, 7  ;;  %v1251_v17 = vsel %vm1187_vm9, %v1249_v42, %v1221_v62 }
 0x28f   : > { %v1256_v24 = vsel %vm1195_vm14, %v1254_v60, %v2267_v47  ;;  %1270 = sbr.rel (!%p1685_p5) target bundleno = 670 (0x29e), region = 66 }
 0x290   : > { %v1258_v19 = vsel %vm1198_vm10, %v1256_v24, %v1244_v14  ;;  %v1253_v20 = vsel %vm1190_vm13, %v1251_v17, %v1227_v56 }
 0x291   : > { %v1260_v35 = vsel %vm1201_vm11, %v1258_v19, 0.0  ;;  %v1255_v54 = vsel %vm2268_vm4, %v1253_v20, %v1233_v50 }
 0x292   : > { %1262 = vst [vmem:[%s1729_s5 + $0x30] sm:$0xff] %v1260_v35  ;;  %v1257_v52 = vsel %vm1195_vm14, %v1255_v54, %v1239_v25 }
 0x293   : > { %v1259_v58 = vsel %vm1198_vm10, %v1257_v52, %v1245_v44 }
 0x294   : > { %v1261_v13 = vsel %vm1201_vm11, %v1259_v58, 0.0 }
 0x295   : > { %1263 = vst [vmem:[%s1729_s5 + $0x38] sm:$0xff] %v1261_v13 }
 0x299   : > { %v1298_v53 = vld [vmem:[%s1729_s5 + $0x30] sm:$0xff] }
 0x29a   : > { %1299 = vst [vmem:[%s1273_s24 + $0x60] sm:$0xff] %v1298_v53 }
 0x29c   : > { %v1300_v15 = vld [vmem:[%s1729_s5 + $0x38] sm:$0xff] }
 0x29d   : > { %1301 = vst [vmem:[%s1273_s24 + $0x68] sm:$0xff] %v1300_v15 }
 0x29e PF: > { %p10_p11 = scmp.ge.s32.totalorder %s1672_s16, 4   ;;  %s2269_s12 = smov %s1599_s13 }
 0x29f   : > { %s2270_s13 = smov %s1683_s19  ;;  %s2271_s14 = smov %s1672_s16 }
 0x2a0   :  { %12 = sbr.rel (!%p10_p11) target bundleno = 2 (0x2), region = 133 }

</bundles_post_ra>
